<compile_context>
chip_gen: v7x
topology: tpu7x:2x2x1
jax: 0.10.0
libtpu: 0.0.40
codegen_flags: <defaults>
</compile_context>

<pallas_src>
import functools

import jax
import jax.numpy as jnp
from jax import lax
from jax.experimental import pallas as pl
from jax.experimental.pallas import tpu as pltpu


_NEG = -1e30  # max-pool padding value (<= any real activation; avoids inf math)


def _round_up(v, m):
    return ((v + m - 1) // m) * m


# ----------------------------------------------------------------------------
# Kernel 1: fused 1x1 convs (s1 | s2a | s3a) + (3x3 max-pool -> s4 1x1)
# ----------------------------------------------------------------------------
def _pointwise_pool_kernel(xf_ref, xpool_ref, w1_ref, b1_ref, w4_ref, b4_ref,
                           ycat_ref, o4_ref, *, H, W):
    # xf_ref    : (1, H*W, Cin)        x, NHWC-flattened
    # xpool_ref : (1, Rpool, Cin)      x spatially padded by 1 with _NEG,
    #                                  flattened as rows of width Wp = W + 2
    # w1_ref    : (Cin, C1+C2a+C3a)    channel-concatenated 1x1 weights
    # w4_ref    : (Cin, C4)            stage4 1x1 weights
    # ycat_ref  : (1, H*W, C1+C2a+C3a) fused ReLU(1x1) outputs
    # o4_ref    : (1, H*Wp, C4)        stage4 output; columns w >= W are junk
    Wp = W + 2
    M4 = H * Wp

    # fused 1x1 conv + bias + ReLU on the MXU (one matmul for three branches)
    ycat = jnp.dot(xf_ref[0], w1_ref[...], preferred_element_type=jnp.float32)
    ycat_ref[0] = jnp.maximum(ycat + b1_ref[...], 0.0).astype(ycat_ref.dtype)

    # 3x3 stride-1 max-pool via 9 shifted row-slices of the padded tile
    pooled = xpool_ref[0, 0:M4, :]
    for kh in range(3):
        for kw in range(3):
            off = kh * Wp + kw
            if off == 0:
                continue
            pooled = jnp.maximum(pooled, xpool_ref[0, off:off + M4, :])

    # stage4 1x1 conv + bias + ReLU on the pooled activations (VMEM-resident)
    o4 = jnp.dot(pooled, w4_ref[...], preferred_element_type=jnp.float32)
    o4_ref[0] = jnp.maximum(o4 + b4_ref[...], 0.0).astype(o4_ref.dtype)


def fused_pointwise_and_pool(x_nhwc, w1cat, b1cat, w4m, b4m):
    N, H, W, Cin = x_nhwc.shape
    Ccat = w1cat.shape[1]
    C4 = w4m.shape[1]
    HW = H * W
    Wp = W + 2
    M4 = H * Wp

    xf = x_nhwc.reshape(N, HW, Cin)                      # contiguous, free

    # padded + flattened copy of x for the in-kernel max-pool taps
    xpool = jnp.pad(x_nhwc, ((0, 0), (1, 1), (1, 1), (0, 0)),
                    constant_values=_NEG)
    xpool = xpool.reshape(N, (H + 2) * Wp, Cin)
    rpool = _round_up(M4 + 2 * Wp + 2, 8)                # last tap read row + 1
    xpool = jnp.pad(xpool, ((0, 0), (0, rpool - xpool.shape[1]), (0, 0)),
                    constant_values=_NEG)

    kernel = functools.partial(_pointwise_pool_kernel, H=H, W=W)
    ycat, o4 = pl.pallas_call(
        kernel,
        out_shape=(jax.ShapeDtypeStruct((N, HW, Ccat), jnp.float32),
                   jax.ShapeDtypeStruct((N, M4, C4), jnp.float32)),
        grid=(N,),
        in_specs=[
            pl.BlockSpec((1, HW, Cin), lambda n: (n, 0, 0)),
            pl.BlockSpec((1, rpool, Cin), lambda n: (n, 0, 0)),
            pl.BlockSpec((Cin, Ccat), lambda n: (0, 0)),
            pl.BlockSpec((1, Ccat), lambda n: (0, 0)),
            pl.BlockSpec((Cin, C4), lambda n: (0, 0)),
            pl.BlockSpec((1, C4), lambda n: (0, 0)),
        ],
        out_specs=(pl.BlockSpec((1, HW, Ccat), lambda n: (n, 0, 0)),
                   pl.BlockSpec((1, M4, C4), lambda n: (n, 0, 0))),
        compiler_params=pltpu.CompilerParams(dimension_semantics=("parallel",)),
    )(xf, xpool, w1cat, b1cat, w4m, b4m)
    return ycat, o4


# ----------------------------------------------------------------------------
# Kernel 2: KxK conv (+bias+ReLU) by in-kernel per-tap MXU accumulation
# ----------------------------------------------------------------------------
def _tap_conv_relu_kernel(tpad_ref, w_ref, b_ref, o_ref, *, K, Wp, M):
    # tpad_ref : (1, Rpad, Cin)     zero-padded input, flattened rows of width Wp
    # w_ref    : (K*K, Cin, Cout)   per-tap weight matrices (kh-major)
    # b_ref    : (1, Cout)
    # o_ref    : (1, M, Cout)       M = H*Wp; columns w >= W are junk (dropped outside)
    cout = o_ref.shape[-1]
    acc = jnp.zeros((M, cout), jnp.float32)
    for kh in range(K):
        for kw in range(K):
            off = kh * Wp + kw
            t = kh * K + kw
            acc = acc + jnp.dot(tpad_ref[0, off:off + M, :], w_ref[t],
                                preferred_element_type=jnp.float32)
    o_ref[0] = jnp.maximum(acc + b_ref[...], 0.0).astype(o_ref.dtype)


def tap_conv_relu(t_nhwc, w_oihw, b, K, pad):
    N, H, W, Cin = t_nhwc.shape
    Cout = w_oihw.shape[0]
    Hp, Wp = H + 2 * pad, W + 2 * pad
    M = H * Wp

    tpad = jnp.pad(t_nhwc, ((0, 0), (pad, pad), (pad, pad), (0, 0)))
    tpad = tpad.reshape(N, Hp * Wp, Cin)
    rpad = _round_up(M + (K - 1) * (Wp + 1), 8)          # last tap read row + 1
    tpad = jnp.pad(tpad, ((0, 0), (0, rpad - Hp * Wp), (0, 0)))

    # (Cout, Cin, K, K) -> (K, K, Cin, Cout) -> (K*K, Cin, Cout)
    w_taps = jnp.transpose(w_oihw, (2, 3, 1, 0)).reshape(K * K, Cin, Cout)

    kernel = functools.partial(_tap_conv_relu_kernel, K=K, Wp=Wp, M=M)
    out = pl.pallas_call(
        kernel,
        out_shape=jax.ShapeDtypeStruct((N, M, Cout), jnp.float32),
        grid=(N,),
        in_specs=[
            pl.BlockSpec((1, rpad, Cin), lambda n: (n, 0, 0)),
            pl.BlockSpec((K * K, Cin, Cout), lambda n: (0, 0, 0)),
            pl.BlockSpec((1, Cout), lambda n: (0, 0)),
        ],
        out_specs=pl.BlockSpec((1, M, Cout), lambda n: (n, 0, 0)),
        compiler_params=pltpu.CompilerParams(dimension_semantics=("parallel",)),
    )(tpad, w_taps, b.reshape(1, Cout))
    # drop the pad columns (w >= W) and restore NHWC
    return out.reshape(N, H, Wp, Cout)[:, :, :W, :]


# ----------------------------------------------------------------------------
# InceptionV1 forward (matches the PyTorch module semantics; NCHW in/out)
# ----------------------------------------------------------------------------
def inception_v1_forward(x_nchw, params):
    w1, b1 = params['s1']
    w2a, b2a = params['s2a']
    w2b, b2b = params['s2b']
    w3a, b3a = params['s3a']
    w3b, b3b = params['s3b']
    w4, b4 = params['s4']
    C1, C2a, C3a = w1.shape[0], w2a.shape[0], w3a.shape[0]

    x = jnp.transpose(x_nchw, (0, 2, 3, 1))              # NCHW -> NHWC
    N, H, W, Cin = x.shape

    # fuse the three 1x1 convs that read x: (Cin, C1+C2a+C3a)
    w1cat = jnp.concatenate(
        [w.reshape(w.shape[0], Cin).T for w in (w1, w2a, w3a)], axis=1)
    b1cat = jnp.concatenate([b1, b2a, b3a]).reshape(1, -1)
    w4m = w4.reshape(w4.shape[0], Cin).T                 # (Cin, C4)

    ycat, o4raw = fused_pointwise_and_pool(x, w1cat, b1cat, w4m,
                                           b4.reshape(1, -1))

    o1 = ycat[:, :, :C1].reshape(N, H, W, C1)
    t2 = ycat[:, :, C1:C1 + C2a].reshape(N, H, W, C2a)
    t3 = ycat[:, :, C1 + C2a:].reshape(N, H, W, C3a)

    o2 = tap_conv_relu(t2, w2b, b2b, K=3, pad=1)
    o3 = tap_conv_relu(t3, w3b, b3b, K=5, pad=2)
    o4 = o4raw.reshape(N, H, W + 2, -1)[:, :, :W, :]

    out = jnp.concatenate([o1, o2, o3, o4], axis=-1)     # cat on channels
    return jnp.transpose(out, (0, 3, 1, 2))              # NHWC -> NCHW


# ----------------------------------------------------------------------------
# Deterministic parameter init (PyTorch Conv2d-style uniform bounds)
# ----------------------------------------------------------------------------
def init_conv_params(key, cout, cin, k):
    kw, kb = jax.random.split(key)
    fan_in = cin * k * k
    bound = 1.0 / (fan_in ** 0.5)
    w = jax.random.uniform(kw, (cout, cin, k, k), jnp.float32, -bound, bound)
    b = jax.random.uniform(kb, (cout,), jnp.float32, -bound, bound)
    return w, b


# ----------------------------------------------------------------------------
# Pure-JAX reference (lax conv / reduce_window) for correctness check
# ----------------------------------------------------------------------------
def _conv_ref(x_nhwc, w_oihw, b, pad):
    w_hwio = jnp.transpose(w_oihw, (2, 3, 1, 0))
    out = lax.conv_general_dilated(
        x_nhwc, w_hwio, window_strides=(1, 1),
        padding=[(pad, pad), (pad, pad)],
        dimension_numbers=('NHWC', 'HWIO', 'NHWC'))
    return jnp.maximum(out + b, 0.0)


def reference_forward(x_nchw, params):
    x = jnp.transpose(x_nchw, (0, 2, 3, 1))
    o1 = _conv_ref(x, *params['s1'], 0)
    t = _conv_ref(x, *params['s2a'], 0)
    o2 = _conv_ref(t, *params['s2b'], 1)
    t = _conv_ref(x, *params['s3a'], 0)
    o3 = _conv_ref(t, *params['s3b'], 2)
    p = lax.reduce_window(x, -jnp.inf, lax.max, (1, 3, 3, 1), (1, 1, 1, 1),
                          [(0, 0), (1, 1), (1, 1), (0, 0)])
    o4 = _conv_ref(p, *params['s4'], 0)
    out = jnp.concatenate([o1, o2, o3, o4], axis=-1)
    return jnp.transpose(out, (0, 3, 1, 2))


if __name__ == "__main__":
    key = jax.random.PRNGKey(0)
    in_ch = 4
    stage1_out = 8
    stage2_out = [4, 8]
    stage3_out = [2, 4]
    stage4_out = 4

    ks = jax.random.split(key, 7)
    params = {
        's1':  init_conv_params(ks[0], stage1_out, in_ch, 1),
        's2a': init_conv_params(ks[1], stage2_out[0], in_ch, 1),
        's2b': init_conv_params(ks[2], stage2_out[1], stage2_out[0], 3),
        's3a': init_conv_params(ks[3], stage3_out[0], in_ch, 1),
        's3b': init_conv_params(ks[4], stage3_out[1], stage3_out[0], 5),
        's4':  init_conv_params(ks[5], stage4_out, in_ch, 1),
    }

    x = jax.random.normal(ks[6], (2, in_ch, 16, 16), jnp.float32)  # NCHW like PyTorch

    out = inception_v1_forward(x, params)
    out = jax.block_until_ready(out)

    expected_c = stage1_out + stage2_out[1] + stage3_out[1] + stage4_out
    assert out.shape == (2, expected_c, 16, 16), out.shape

    ref = reference_forward(x, params)
    assert jnp.allclose(out, ref, rtol=1e-3, atol=1e-3), "mismatch vs lax reference"

    print("KERNEL_OK")
</pallas_src>

<mosaic_0001>
module attributes {stable_mosaic.version = 11 : i64} {
  func.func @_pointwise_pool_kernel(%arg0: i32, %arg1: memref<1x256x4xf32, #tpu.memory_space<vmem>>, %arg2: memref<1x328x4xf32, #tpu.memory_space<vmem>>, %arg3: memref<4x14xf32, #tpu.memory_space<vmem>>, %arg4: memref<1x14xf32, #tpu.memory_space<vmem>>, %arg5: memref<4x4xf32, #tpu.memory_space<vmem>>, %arg6: memref<1x4xf32, #tpu.memory_space<vmem>>, %arg7: memref<1x256x14xf32, #tpu.memory_space<vmem>>, %arg8: memref<1x288x4xf32, #tpu.memory_space<vmem>>) attributes {dimension_semantics = [#tpu.dimension_semantics<parallel>], iteration_bounds = array<i64: 2>, scalar_prefetch = 0 : i64, scratch_operands = 0 : i64, tpu.core_type = #tpu.core_type<tc>, window_params = [{transform_indices = @transform_0, window_bounds = array<i64: 1, 256, 4>}, {transform_indices = @transform_1, window_bounds = array<i64: 1, 328, 4>}, {pipeline_mode = #tpu.pipeline_mode<synchronous>, transform_indices = @transform_2, window_bounds = array<i64: 4, 14>}, {pipeline_mode = #tpu.pipeline_mode<synchronous>, transform_indices = @transform_3, window_bounds = array<i64: 1, 14>}, {pipeline_mode = #tpu.pipeline_mode<synchronous>, transform_indices = @transform_4, window_bounds = array<i64: 4, 4>}, {pipeline_mode = #tpu.pipeline_mode<synchronous>, transform_indices = @transform_5, window_bounds = array<i64: 1, 4>}, {transform_indices = @transform_6, window_bounds = array<i64: 1, 256, 14>}, {transform_indices = @transform_7, window_bounds = array<i64: 1, 288, 4>}]} {
    %c0 = arith.constant 0 : index
    %c0_0 = arith.constant 0 : index
    %c0_1 = arith.constant 0 : index
    %0 = vector.load %arg1[%c0, %c0_0, %c0_1] : memref<1x256x4xf32, #tpu.memory_space<vmem>>, vector<1x256x4xf32>
    %1 = vector.shape_cast %0 : vector<1x256x4xf32> to vector<256x4xf32>
    %c0_2 = arith.constant 0 : index
    %c0_3 = arith.constant 0 : index
    %2 = vector.load %arg3[%c0_2, %c0_3] : memref<4x14xf32, #tpu.memory_space<vmem>>, vector<4x14xf32>
    %cst = arith.constant dense<0.000000e+00> : vector<256x14xf32>
    %3 = tpu.matmul %1, %2, %cst {dimension_numbers = #tpu.dot_dimension_numbers<[1], [0], [0], [1], [0, 0, 1, 1], [], []>} : vector<256x4xf32>, vector<4x14xf32>, vector<256x14xf32> -> vector<256x14xf32>
    %c0_4 = arith.constant 0 : index
    %c0_5 = arith.constant 0 : index
    %4 = vector.load %arg4[%c0_4, %c0_5] : memref<1x14xf32, #tpu.memory_space<vmem>>, vector<1x14xf32>
    %5 = vector.broadcast %4 : vector<1x14xf32> to vector<256x14xf32>
    %6 = arith.addf %3, %5 : vector<256x14xf32>
    %cst_6 = arith.constant 0.000000e+00 : f32
    %7 = vector.broadcast %cst_6 : f32 to vector<256x14xf32>
    %8 = arith.maximumf %6, %7 : vector<256x14xf32>
    %c0_7 = arith.constant 0 : index
    %c0_8 = arith.constant 0 : index
    %c0_9 = arith.constant 0 : index
    %9 = vector.load %arg7[%c0_7, %c0_8, %c0_9] : memref<1x256x14xf32, #tpu.memory_space<vmem>>, vector<1x256x14xf32>
    %10 = vector.shape_cast %9 : vector<1x256x14xf32> to vector<256x14xf32>
    %11 = vector.shape_cast %8 : vector<256x14xf32> to vector<1x256x14xf32>
    tpu.vector_store %arg7[%c0_7, %c0_8, %c0_9], %11 {strides = array<i32>} : memref<1x256x14xf32, #tpu.memory_space<vmem>>, vector<1x256x14xf32>,
    %c0_10 = arith.constant 0 : index
    %c0_11 = arith.constant 0 : index
    %c0_12 = arith.constant 0 : index
    %12 = vector.load %arg2[%c0_10, %c0_11, %c0_12] : memref<1x328x4xf32, #tpu.memory_space<vmem>>, vector<1x288x4xf32>
    %13 = vector.shape_cast %12 : vector<1x288x4xf32> to vector<288x4xf32>
    %c0_13 = arith.constant 0 : index
    %c1 = arith.constant 1 : index
    %c0_14 = arith.constant 0 : index
    %14 = vector.load %arg2[%c0_13, %c1, %c0_14] : memref<1x328x4xf32, #tpu.memory_space<vmem>>, vector<1x288x4xf32>
    %15 = vector.shape_cast %14 : vector<1x288x4xf32> to vector<288x4xf32>
    %16 = arith.maximumf %13, %15 : vector<288x4xf32>
    %c0_15 = arith.constant 0 : index
    %c2 = arith.constant 2 : index
    %c0_16 = arith.constant 0 : index
    %17 = vector.load %arg2[%c0_15, %c2, %c0_16] : memref<1x328x4xf32, #tpu.memory_space<vmem>>, vector<1x288x4xf32>
    %18 = vector.shape_cast %17 : vector<1x288x4xf32> to vector<288x4xf32>
    %19 = arith.maximumf %16, %18 : vector<288x4xf32>
    %c0_17 = arith.constant 0 : index
    %c18 = arith.constant 18 : index
    %c0_18 = arith.constant 0 : index
    %20 = vector.load %arg2[%c0_17, %c18, %c0_18] : memref<1x328x4xf32, #tpu.memory_space<vmem>>, vector<1x288x4xf32>
    %21 = vector.shape_cast %20 : vector<1x288x4xf32> to vector<288x4xf32>
    %22 = arith.maximumf %19, %21 : vector<288x4xf32>
    %c0_19 = arith.constant 0 : index
    %c19 = arith.constant 19 : index
    %c0_20 = arith.constant 0 : index
    %23 = vector.load %arg2[%c0_19, %c19, %c0_20] : memref<1x328x4xf32, #tpu.memory_space<vmem>>, vector<1x288x4xf32>
    %24 = vector.shape_cast %23 : vector<1x288x4xf32> to vector<288x4xf32>
    %25 = arith.maximumf %22, %24 : vector<288x4xf32>
    %c0_21 = arith.constant 0 : index
    %c20 = arith.constant 20 : index
    %c0_22 = arith.constant 0 : index
    %26 = vector.load %arg2[%c0_21, %c20, %c0_22] : memref<1x328x4xf32, #tpu.memory_space<vmem>>, vector<1x288x4xf32>
    %27 = vector.shape_cast %26 : vector<1x288x4xf32> to vector<288x4xf32>
    %28 = arith.maximumf %25, %27 : vector<288x4xf32>
    %c0_23 = arith.constant 0 : index
    %c36 = arith.constant 36 : index
    %c0_24 = arith.constant 0 : index
    %29 = vector.load %arg2[%c0_23, %c36, %c0_24] : memref<1x328x4xf32, #tpu.memory_space<vmem>>, vector<1x288x4xf32>
    %30 = vector.shape_cast %29 : vector<1x288x4xf32> to vector<288x4xf32>
    %31 = arith.maximumf %28, %30 : vector<288x4xf32>
    %c0_25 = arith.constant 0 : index
    %c37 = arith.constant 37 : index
    %c0_26 = arith.constant 0 : index
    %32 = vector.load %arg2[%c0_25, %c37, %c0_26] : memref<1x328x4xf32, #tpu.memory_space<vmem>>, vector<1x288x4xf32>
    %33 = vector.shape_cast %32 : vector<1x288x4xf32> to vector<288x4xf32>
    %34 = arith.maximumf %31, %33 : vector<288x4xf32>
    %c0_27 = arith.constant 0 : index
    %c38 = arith.constant 38 : index
    %c0_28 = arith.constant 0 : index
    %35 = vector.load %arg2[%c0_27, %c38, %c0_28] : memref<1x328x4xf32, #tpu.memory_space<vmem>>, vector<1x288x4xf32>
    %36 = vector.shape_cast %35 : vector<1x288x4xf32> to vector<288x4xf32>
    %37 = arith.maximumf %34, %36 : vector<288x4xf32>
    %c0_29 = arith.constant 0 : index
    %c0_30 = arith.constant 0 : index
    %38 = vector.load %arg5[%c0_29, %c0_30] : memref<4x4xf32, #tpu.memory_space<vmem>>, vector<4x4xf32>
    %cst_31 = arith.constant dense<0.000000e+00> : vector<288x4xf32>
    %39 = tpu.matmul %37, %38, %cst_31 {dimension_numbers = #tpu.dot_dimension_numbers<[1], [0], [0], [1], [0, 0, 1, 1], [], []>} : vector<288x4xf32>, vector<4x4xf32>, vector<288x4xf32> -> vector<288x4xf32>
    %c0_32 = arith.constant 0 : index
    %c0_33 = arith.constant 0 : index
    %40 = vector.load %arg6[%c0_32, %c0_33] : memref<1x4xf32, #tpu.memory_space<vmem>>, vector<1x4xf32>
    %41 = vector.broadcast %40 : vector<1x4xf32> to vector<288x4xf32>
    %42 = arith.addf %39, %41 : vector<288x4xf32>
    %cst_34 = arith.constant 0.000000e+00 : f32
    %43 = vector.broadcast %cst_34 : f32 to vector<288x4xf32>
    %44 = arith.maximumf %42, %43 : vector<288x4xf32>
    %c0_35 = arith.constant 0 : index
    %c0_36 = arith.constant 0 : index
    %c0_37 = arith.constant 0 : index
    %45 = vector.load %arg8[%c0_35, %c0_36, %c0_37] : memref<1x288x4xf32, #tpu.memory_space<vmem>>, vector<1x288x4xf32>
    %46 = vector.shape_cast %45 : vector<1x288x4xf32> to vector<288x4xf32>
    %47 = vector.shape_cast %44 : vector<288x4xf32> to vector<1x288x4xf32>
    tpu.vector_store %arg8[%c0_35, %c0_36, %c0_37], %47 {strides = array<i32>} : memref<1x288x4xf32, #tpu.memory_space<vmem>>, vector<1x288x4xf32>,
    return
  }
  func.func @transform_0(%arg0: i32) -> (i32, i32, i32) {
    %c0_i32 = arith.constant 0 : i32
    %c0_i32_0 = arith.constant 0 : i32
    %c0_i32_1 = arith.constant 0 : i32
    return %arg0, %c0_i32, %c0_i32_0 : i32, i32, i32
  }
  func.func @transform_1(%arg0: i32) -> (i32, i32, i32) {
    %c0_i32 = arith.constant 0 : i32
    %c0_i32_0 = arith.constant 0 : i32
    %c0_i32_1 = arith.constant 0 : i32
    return %arg0, %c0_i32, %c0_i32_0 : i32, i32, i32
  }
  func.func @transform_2(%arg0: i32) -> (i32, i32) {
    %c0_i32 = arith.constant 0 : i32
    %c0_i32_0 = arith.constant 0 : i32
    %c0_i32_1 = arith.constant 0 : i32
    return %c0_i32, %c0_i32_0 : i32, i32
  }
  func.func @transform_3(%arg0: i32) -> (i32, i32) {
    %c0_i32 = arith.constant 0 : i32
    %c0_i32_0 = arith.constant 0 : i32
    %c0_i32_1 = arith.constant 0 : i32
    return %c0_i32, %c0_i32_0 : i32, i32
  }
  func.func @transform_4(%arg0: i32) -> (i32, i32) {
    %c0_i32 = arith.constant 0 : i32
    %c0_i32_0 = arith.constant 0 : i32
    %c0_i32_1 = arith.constant 0 : i32
    return %c0_i32, %c0_i32_0 : i32, i32
  }
  func.func @transform_5(%arg0: i32) -> (i32, i32) {
    %c0_i32 = arith.constant 0 : i32
    %c0_i32_0 = arith.constant 0 : i32
    %c0_i32_1 = arith.constant 0 : i32
    return %c0_i32, %c0_i32_0 : i32, i32
  }
  func.func @transform_6(%arg0: i32) -> (i32, i32, i32) {
    %c0_i32 = arith.constant 0 : i32
    %c0_i32_0 = arith.constant 0 : i32
    %c0_i32_1 = arith.constant 0 : i32
    return %arg0, %c0_i32, %c0_i32_0 : i32, i32, i32
  }
  func.func @transform_7(%arg0: i32) -> (i32, i32, i32) {
    %c0_i32 = arith.constant 0 : i32
    %c0_i32_0 = arith.constant 0 : i32
    %c0_i32_1 = arith.constant 0 : i32
    return %arg0, %c0_i32, %c0_i32_0 : i32, i32, i32
  }
}

</mosaic_0001>

<bundles_post_ra>
// kernel: tpu_custom_call.1
= control target key start
LH: loop header
LB: loop body
LE: loop exit
PB: predicated region body
PF: predicated region fallthrough
CT: control target
= control target key end

     0   :  { %s2146_s24 = smov 0   ;;  %s2833_s0 = inlined_call_operand.vmem [shape: f32[2,256,4], index: 0, kind: input, shape index: {}]   ;;  %s2834_s1 = inlined_call_operand.vmem [shape: f32[2,328,4], index: 1, kind: input, shape index: {}]   ;;  %s2835_s2 = inlined_call_operand.vmem [shape: f32[4,14], index: 2, kind: input, shape index: {}]   ;;  %s2836_s3 = inlined_call_operand.vmem [shape: f32[1,14], index: 3, kind: input, shape index: {}]   ;;  %s2837_s4 = inlined_call_operand.vmem [shape: f32[4,4], index: 4, kind: input, shape index: {}]   ;;  %s2838_s5 = inlined_call_operand.vmem [shape: f32[1,4], index: 5, kind: input, shape index: {}]   ;;  %s2839_s6 = inlined_call_operand.vmem [shape: f32[2,256,14], index: 6, kind: output, shape index: {0}]   ;;  %s2840_s7 = inlined_call_operand.vmem [shape: f32[2,288,4], index: 7, kind: output, shape index: {1}]  }
   0x1 LB: > { %s1823_s25 = sadd.s32 4294967295, %s2104_s24   ;;  %p1827_p0 = scmp.ge.s32.totalorder %s2104_s24, 1  ;;  %s2104_s24 = sphi %s2146_s24, %s18_s24  }
   0x2   : > { %p250_p1 = scmp.lt.s32.totalorder %s2104_s24, 3 }
   0x4   : > { %p251_p2 = pnand %p1827_p0, %p250_p1 }
   0x5   : > { %v344_v0 = vld [vmem:[%s2835_s2] sm:$0xf] (!%p251_p2)  ;;  %vm449_vm0 = vcmask (!%p251_p2), 1043456   ;;  %p292_p3 = scmp.lt.s32.totalorder (!%p251_p2), %s1823_s25, 1  ;;  %vm352_vm1 = vcmask (!%p251_p2), 31744   ;;  %vm710_vm2 = vcmask (!%p251_p2), 113664  }
   0x6   : > { %254 = sbr.rel (%p251_p2) target bundleno = 342 (0x156), region = 44  ;;  %1980 = vmatprep.subr.msk.mxu0 (!%p251_p2), %vm449_vm0, %v344_v0  ;;  %v1287_v1 = vld [vmem:[%s2837_s4] sm:$0xf] (!%p251_p2) }
   0x7   : > { %1981 = vmatpush3.msk.msra.mxu0 (!%p251_p2), %vm449_vm0, %v344_v0  ;;  %2086 = vmatprep.subr.msk.mxu1 (!%p251_p2), %vm449_vm0, %v1287_v1 }
   0x8   : > { %2030 = vmatprep.subr.msk.mxu0 (!%p251_p2), %vm449_vm0, %v1287_v1  ;;  %2087 = vmatpush3.msk.msra.mxu1 (!%p251_p2), %vm449_vm0, %v1287_v1 }
   0xd   : > { %s2842_s25 = smov (!%p292_p3, %s1823_s25), 1 }
   0xe   : > { %s1908_s30 = sshll.u32 %s2842_s25, 8  ;;  %s2088_s8 = smul.u32 328, %s2842_s25 }
   0xf   : > { %s2174_s11 = scalar_lea.vmem %s2833_s0, %s1908_s30  ;;  %s2614_s19 = scalar_lea.vmem %s2839_s6, %s1908_s30 }
  0x10   : > { %s2179_s14 = scalar_lea.vmem %s2834_s1, %s2088_s8  ;;  %v312_v2 = vld [vmem:[%s2174_s11] sm:$0xff]  ;;  %v313_v3 = vld [vmem:[%s2174_s11 + $0x8] sm:$0xff]  ;;  %v314_v4 = vld [vmem:[%s2174_s11 + $0x10] sm:$0xff]  ;;  %s2089_s20 = smul.u32 288, %s2842_s25 }
  0x11   : > { %1982 = vmatprep.mubr.msk.f32.mxu0 %vm352_vm1, %v312_v2  ;;  %v743_v5 = vld [vmem:[%s2179_s14] sm:$0xff]  ;;  %v745_v6 = vld [vmem:[%s2179_s14 + $0x10] sm:$0xff]  ;;  %v744_v37 = vld [vmem:[%s2179_s14 + $0x8] sm:$0xff] }
  0x12   : > { %v747_v7 = vld [vmem:[%s2179_s14 + $0x20] sm:$0xff]  ;;  %1983 = vmatmul.mubr.msk.f32.vlgmr.msra.gmra.mrb[0].mxu0 %vm352_vm1, %v313_v3  ;;  %v749_v8 = vld [vmem:[%s2179_s14 + $0x30] sm:$0xff]  ;;  %v746_v38 = vld [vmem:[%s2179_s14 + $0x18] sm:$0xff]  ;;  %s2647_s26 = scalar_lea.vmem %s2840_s7, %s2089_s20 }
  0x13   : > { %v779_v9 = vld [vmem:[%s2179_s14 + $0x1] sm:$0xff]  ;;  %v781_v10 = vld [vmem:[%s2179_s14 + $0x11] sm:$0xff]  ;;  %2031 = vmatpush3.msk.msra.mxu0 %vm449_vm0, %v1287_v1  ;;  %1985 = vmatprep.mubr.msk.f32.mxu0 %vm352_vm1, %v314_v4  ;;  %v780_v41 = vld [vmem:[%s2179_s14 + $0x9] sm:$0xff] }
  0x14   : > { %v783_v11 = vld [vmem:[%s2179_s14 + $0x21] sm:$0xff]  ;;  %v785_v12 = vld [vmem:[%s2179_s14 + $0x31] sm:$0xff]  ;;  %v815_v13 = vmax.f32 %v743_v5, %v779_v9  ;;  %v817_v14 = vmax.f32 %v745_v6, %v781_v10  ;;  %v782_v42 = vld [vmem:[%s2179_s14 + $0x19] sm:$0xff]  ;;  %v816_v46 = vmax.f32 %v744_v37, %v780_v41 }
  0x15   : > { %v819_v15 = vmax.f32 %v747_v7, %v783_v11  ;;  %v821_v16 = vmax.f32 %v749_v8, %v785_v12  ;;  %v851_v17 = vld [vmem:[%s2179_s14 + $0x2] sm:$0xff]  ;;  %v853_v18 = vld [vmem:[%s2179_s14 + $0x12] sm:$0xff]  ;;  %v852_v43 = vld [vmem:[%s2179_s14 + $0xa] sm:$0xff]  ;;  %v818_v47 = vmax.f32 %v746_v38, %v782_v42 }
  0x16   : > { %v855_v19 = vld [vmem:[%s2179_s14 + $0x22] sm:$0xff]  ;;  %v857_v20 = vld [vmem:[%s2179_s14 + $0x32] sm:$0xff]  ;;  %v887_v21 = vmax.f32 %v815_v13, %v851_v17  ;;  %v889_v23 = vmax.f32 %v817_v14, %v853_v18  ;;  %v854_v48 = vld [vmem:[%s2179_s14 + $0x1a] sm:$0xff]  ;;  %v888_v58 = vmax.f32 %v816_v46, %v852_v43 }
  0x17   : > { %v2201_v22 = vld [vmem:[%s2179_s14 + $0x42] sm:$0xff]  ;;  %v891_v24 = vmax.f32 %v819_v15, %v855_v19  ;;  %v893_v25 = vmax.f32 %v821_v16, %v857_v20  ;;  %v961_v26 = vld [vmem:[%s2179_s14 + $0x13] sm:$0xff]  ;;  %v856_v53 = vld [vmem:[%s2179_s14 + $0x2a] sm:$0xff]  ;;  %v890_v59 = vmax.f32 %v818_v47, %v854_v48 }
  0x18   : > { %v925_v27 = vmax.f32 %v887_v21, %v853_v18  ;;  %v963_v28 = vld [vmem:[%s2179_s14 + $0x23] sm:$0xff]  ;;  %v965_v29 = vld [vmem:[%s2179_s14 + $0x33] sm:$0xff]  ;;  %v927_v30 = vmax.f32 %v889_v23, %v855_v19  ;;  %v962_v61 = vld [vmem:[%s2179_s14 + $0x1b] sm:$0xff]  ;;  %v926_v2 = vmax.f32 %v888_v58, %v854_v48 }
  0x19   : > { %v929_v31 = vmax.f32 %v891_v24, %v857_v20  ;;  %v967_v32 = vld [vmem:[%s2179_s14 + $0x43] sm:$0xff]  ;;  %v1033_v33 = vld [vmem:[%s2179_s14 + $0x14] sm:$0xff]  ;;  %v931_v34 = vmax.f32 %v893_v25, %v2201_v22  ;;  %v964_v62 = vld [vmem:[%s2179_s14 + $0x2b] sm:$0xff]  ;;  %v928_v3 = vmax.f32 %v890_v59, %v856_v53 }
  0x1a   : > { %v997_v35 = vmax.f32 %v925_v27, %v961_v26  ;;  %v1035_v36 = vld [vmem:[%s2179_s14 + $0x24] sm:$0xff]  ;;  %v999_v39 = vmax.f32 %v927_v30, %v963_v28  ;;  %v1037_v44 = vld [vmem:[%s2179_s14 + $0x34] sm:$0xff]  ;;  %v1034_v8 = vld [vmem:[%s2179_s14 + $0x1c] sm:$0xff]  ;;  %v998_v12 = vmax.f32 %v926_v2, %v962_v61 }
  0x1b   : > { %v1001_v40 = vmax.f32 %v929_v31, %v965_v29  ;;  %v751_v49 = vld [vmem:[%s2179_s14 + $0x40] sm:$0xff]  ;;  %v1003_v54 = vmax.f32 %v931_v34, %v967_v32  ;;  %v1145_v57 = vld [vmem:[%s2179_s14 + $0x35] sm:$0xff]  ;;  %v748_v4 = vld [vmem:[%s2179_s14 + $0x28] sm:$0xff]  ;;  %v1000_v13 = vmax.f32 %v928_v3, %v964_v62 }
  0x1c   : > { %v1069_v45 = vmax.f32 %v997_v35, %v1033_v33  ;;  %v787_v50 = vld [vmem:[%s2179_s14 + $0x41] sm:$0xff]  ;;  %v1071_v51 = vmax.f32 %v999_v39, %v1035_v36  ;;  %v315_v63 = vld [vmem:[%s2174_s11 + $0x18] sm:$0xff]  ;;  %v784_v5 = vld [vmem:[%s2179_s14 + $0x29] sm:$0xff]  ;;  %v1070_v24 = vmax.f32 %v998_v12, %v1034_v8 }
  0x1d   : > { %v1073_v52 = vmax.f32 %v1001_v40, %v1037_v44  ;;  %v1039_v55 = vld [vmem:[%s2179_s14 + $0x44] sm:$0xff]  ;;  %v823_v0 = vmax.f32 %v751_v49, %v787_v50  ;;  %v1217_v1 = vld [vmem:[%s2179_s14 + $0x36] sm:$0xff]  ;;  %1986 = vmatmul.mubr.msk.f32.gmra.mrb[2].mxu0 %vm352_vm1, %v315_v63  ;;  %v1036_v9 = vld [vmem:[%s2179_s14 + $0x2c] sm:$0xff]  ;;  %v820_v10 = vmax.f32 %v748_v4, %v784_v5 }
  0x1e   : > { %v2221_v56 = vmax.f32 %v1069_v45, %v1035_v36  ;;  %v1109_v60 = vmax.f32 %v1071_v51, %v1037_v44  ;;  %v1075_v11 = vmax.f32 %v1003_v54, %v1039_v55  ;;  %v1147_v14 = vld [vmem:[%s2179_s14 + $0x45] sm:$0xff]  ;;  %v858_v15 = vld [vmem:[%s2179_s14 + $0x3a] sm:$0xff]  ;;  %v1072_v25 = vmax.f32 %v1000_v13, %v1036_v9  ;;  %v318_v39 = vld [vmem:[%s2174_s11 + $0x30] sm:$0xff] }
  0x1f   : > { %v1111_v6 = vmax.f32 %v1073_v52, %v1039_v55  ;;  %v316_v16 = vld [vmem:[%s2174_s11 + $0x20] sm:$0xff]  ;;  %v892_v19 = vmax.f32 %v820_v10, %v856_v53  ;;  %v317_v20 = vld [vmem:[%s2174_s11 + $0x28] sm:$0xff]  ;;  %v2240_v21 = vld [vmem:[%s2179_s14 + $0x54] sm:$0xff]  ;;  %v895_v23 = vmax.f32 %v823_v0, %v2201_v22  ;;  %v2251_v34 = vmax.f32 %v1070_v24, %v1036_v9 }
  0x20   : > { %v1181_v7 = vmax.f32 %v1109_v60, %v1145_v57  ;;  %v1038_v18 = vld [vmem:[%s2179_s14 + $0x3c] sm:$0xff]  ;;  %1988 = vmatprep.mubr.msk.f32.mxu0 %vm352_vm1, %v316_v16  ;;  %v1219_v32 = vld [vmem:[%s2179_s14 + $0x46] sm:$0xff]  ;;  %v1113_v36 = vmax.f32 %v1075_v11, %v2240_v21  ;;  %v861_v43 = vld [vmem:[%s2179_s14 + $0x52] sm:$0xff] }
  0x21   : > { %v966_v26 = vld [vmem:[%s2179_s14 + $0x3b] sm:$0xff]  ;;  %1989 = vmatmul.mubr.msk.f32.gmra.mrb[4].mxu0 %vm352_vm1, %v317_v20  ;;  %v1183_v31 = vmax.f32 %v1111_v6, %v1147_v14  ;;  %v930_v22 = vmax.f32 %v892_v19, %v858_v15  ;;  %v1110_v35 = vmax.f32 %v1072_v25, %v1038_v18  ;;  %v860_v38 = vld [vmem:[%s2179_s14 + $0x4a] sm:$0xff]  ;;  %v969_v44 = vld [vmem:[%s2179_s14 + $0x53] sm:$0xff]  ;;  %v933_v48 = vmax.f32 %v895_v23, %v861_v43 }
  0x22   : > { %v1253_v17 = vmax.f32 %v1181_v7, %v1217_v1  ;;  %v750_v27 = vld [vmem:[%s2179_s14 + $0x38] sm:$0xff]  ;;  %1991 = vmatprep.mubr.msk.f32.mxu0 %vm352_vm1, %v318_v39  ;;  %v1040_v46 = vld [vmem:[%s2179_s14 + $0x4c] sm:$0xff]  ;;  %v2270_v61 = vld [vmem:[%s2179_s14 + $0x64] sm:$0xff] }
  0x23   : > { %v786_v28 = vld [vmem:[%s2179_s14 + $0x39] sm:$0xff]  ;;  %v1002_v40 = vmax.f32 %v930_v22, %v966_v26  ;;  %v968_v47 = vld [vmem:[%s2179_s14 + $0x4b] sm:$0xff]  ;;  %v1255_v49 = vmax.f32 %v1183_v31, %v1219_v32  ;;  %v1005_v60 = vmax.f32 %v933_v48, %v969_v44  ;;  %v971_v31 = vld [vmem:[%s2179_s14 + $0x63] sm:$0xff] }
  0x24   : > { %2035 = vmatprep.mubr.msk.f32.mxu1 %vm352_vm1, %v1253_v17  ;;  %v1146_v29 = vld [vmem:[%s2179_s14 + $0x3d] sm:$0xff]  ;;  %v822_v33 = vmax.f32 %v750_v27, %v786_v28  ;;  %v1149_v37 = vld [vmem:[%s2179_s14 + $0x55] sm:$0xff]  ;;  %v1148_v51 = vld [vmem:[%s2179_s14 + $0x4d] sm:$0xff] }
  0x25   : > { %v1218_v30 = vld [vmem:[%s2179_s14 + $0x3e] sm:$0xff]  ;;  %v1182_v45 = vmax.f32 %v1110_v35, %v1146_v29  ;;  %v1074_v50 = vmax.f32 %v1002_v40, %v1038_v18  ;;  %v752_v53 = vld [vmem:[%s2179_s14 + $0x48] sm:$0xff]  ;;  %v1185_v58 = vmax.f32 %v1113_v36, %v1149_v37  ;;  %v1221_v59 = vld [vmem:[%s2179_s14 + $0x56] sm:$0xff]  ;;  %v1077_v5 = vmax.f32 %v1005_v60, %v2240_v21 }
  0x26   : > { %v894_v41 = vmax.f32 %v822_v33, %v858_v15  ;;  %v319_v42 = vld [vmem:[%s2174_s11 + $0x38] sm:$0xff]  ;;  %v788_v54 = vld [vmem:[%s2179_s14 + $0x49] sm:$0xff]  ;;  %v320_v2 = vld [vmem:[%s2174_s11 + $0x40] sm:$0xff] }
  0x27   : > { %1992 = vmatmul.mubr.msk.f32.gmra.mrb[6].mxu0 %vm352_vm1, %v319_v42  ;;  %v1254_v55 = vmax.f32 %v1182_v45, %v1218_v30  ;;  %v1220_v57 = vld [vmem:[%s2179_s14 + $0x4e] sm:$0xff]  ;;  %v824_v62 = vmax.f32 %v752_v53, %v788_v54  ;;  %v1112_v63 = vmax.f32 %v1074_v50, %v1040_v46  ;;  %v862_v1 = vld [vmem:[%s2179_s14 + $0x5a] sm:$0xff]  ;;  %v1151_v12 = vld [vmem:[%s2179_s14 + $0x65] sm:$0xff]  ;;  %v1257_v15 = vmax.f32 %v1185_v58, %v1221_v59 }
  0x28   : > { %v932_v52 = vmax.f32 %v894_v41, %v860_v38  ;;  %v321_v3 = vld [vmem:[%s2174_s11 + $0x48] sm:$0xff]  ;;  %v1042_v4 = vld [vmem:[%s2179_s14 + $0x5c] sm:$0xff]  ;;  %1994 = vmatprep.mubr.msk.f32.mxu0 %vm352_vm1, %v320_v2  ;;  %v753_v7 = vld [vmem:[%s2179_s14 + $0x50] sm:$0xff]  ;;  %v1115_v16 = vmax.f32 %v1077_v5, %v2270_v61 }
  0x29   : > { %2036 = vmatmul.mubr.msk.f32.vlgmr.msra.gmra.mrb[0].mxu1 %vm352_vm1, %v1254_v55  ;;  %v896_v6 = vmax.f32 %v824_v62, %v860_v38  ;;  %v789_v8 = vld [vmem:[%s2179_s14 + $0x51] sm:$0xff]  ;;  %v1184_v9 = vmax.f32 %v1112_v63, %v1148_v51  ;;  %v1150_v11 = vld [vmem:[%s2179_s14 + $0x5d] sm:$0xff]  ;;  %v1223_v25 = vld [vmem:[%s2179_s14 + $0x66] sm:$0xff] }
  0x2a   : > { %v1004_v0 = vmax.f32 %v932_v52, %v968_v47  ;;  %2038 = vmatprep.mubr.msk.f32.mxu1 %vm352_vm1, %v1255_v49  ;;  %v970_v13 = vld [vmem:[%s2179_s14 + $0x5b] sm:$0xff]  ;;  %v825_v14 = vmax.f32 %v753_v7, %v789_v8  ;;  %v1044_v26 = vld [vmem:[%s2179_s14 + $0x6c] sm:$0xff]  ;;  %v1187_v29 = vmax.f32 %v1115_v16, %v1151_v12  ;;  %v2327_v12 = vld [vmem:[%s2179_s14 + $0x84] sm:$0xff] }
  0x2b   : > { %1995 = vmatmul.mubr.msk.f32.gmra.mrb[8].mxu0 %vm352_vm1, %v321_v3  ;;  %v934_v17 = vmax.f32 %v896_v6, %v862_v1  ;;  %v863_v18 = vld [vmem:[%s2179_s14 + $0x62] sm:$0xff]  ;;  %v754_v19 = vld [vmem:[%s2179_s14 + $0x58] sm:$0xff]  ;;  %v1256_v21 = vmax.f32 %v1184_v9, %v1220_v57  ;;  %v864_v32 = vld [vmem:[%s2179_s14 + $0x6a] sm:$0xff] }
  0x2c   : > { %v1076_v10 = vmax.f32 %v1004_v0, %v1040_v46  ;;  %v790_v20 = vld [vmem:[%s2179_s14 + $0x59] sm:$0xff]  ;;  %v897_v27 = vmax.f32 %v825_v14, %v861_v43  ;;  %v322_v22 = vld [vmem:[%s2174_s11 + $0x50] sm:$0xff]  ;;  %v791_v39 = vld [vmem:[%s2179_s14 + $0x61] sm:$0xff]  ;;  %v1259_v40 = vmax.f32 %v1187_v29, %v1223_v25 }
  0x2d   : > { %v1222_v24 = vld [vmem:[%s2179_s14 + $0x5e] sm:$0xff]  ;;  %v826_v28 = vmax.f32 %v754_v19, %v790_v20  ;;  %v1006_v30 = vmax.f32 %v934_v17, %v970_v13  ;;  %2039 = vmatmul.mubr.msk.f32.gmra.mrb[2].mxu1 %vm352_vm1, %v1256_v21  ;;  %1997 = vmatprep.mubr.msk.f32.mxu0 %vm352_vm1, %v322_v22  ;;  %v1152_v42 = vld [vmem:[%s2179_s14 + $0x6d] sm:$0xff]  ;;  %v1153_v53 = vld [vmem:[%s2179_s14 + $0x75] sm:$0xff] }
  0x2e   : > { %v1114_v23 = vmax.f32 %v1076_v10, %v1042_v4  ;;  %v935_v35 = vmax.f32 %v897_v27, %v863_v18  ;;  %v323_v37 = vld [vmem:[%s2174_s11 + $0x58] sm:$0xff]  ;;  %v755_v38 = vld [vmem:[%s2179_s14 + $0x60] sm:$0xff]  ;;  %2041 = vmatprep.mubr.msk.f32.mxu1 %vm352_vm1, %v1257_v15  ;;  %v972_v43 = vld [vmem:[%s2179_s14 + $0x6b] sm:$0xff] }
  0x2f   : > { %v898_v36 = vmax.f32 %v826_v28, %v862_v1  ;;  %v1078_v41 = vmax.f32 %v1006_v30, %v1042_v4  ;;  %1998 = vmatmul.mubr.msk.f32.gmra.mrb[10].mxu0 %vm352_vm1, %v323_v37  ;;  %v827_v44 = vmax.f32 %v755_v38, %v791_v39  ;;  %v1224_v46 = vld [vmem:[%s2179_s14 + $0x6e] sm:$0xff]  ;;  %v2314_v59 = vld [vmem:[%s2179_s14 + $0x7c] sm:$0xff] }
  0x30   : > { %v1186_v33 = vmax.f32 %v1114_v23, %v1150_v11  ;;  %v1007_v47 = vmax.f32 %v935_v35, %v971_v31  ;;  %v865_v49 = vld [vmem:[%s2179_s14 + $0x72] sm:$0xff]  ;;  %v756_v50 = vld [vmem:[%s2179_s14 + $0x68] sm:$0xff]  ;;  %v866_v63 = vld [vmem:[%s2179_s14 + $0x7a] sm:$0xff] }
  0x31   : > { %v936_v48 = vmax.f32 %v898_v36, %v864_v32  ;;  %v1116_v51 = vmax.f32 %v1078_v41, %v1044_v26  ;;  %v1045_v52 = vld [vmem:[%s2179_s14 + $0x74] sm:$0xff]  ;;  %v899_v54 = vmax.f32 %v827_v44, %v863_v18  ;;  %v792_v55 = vld [vmem:[%s2179_s14 + $0x69] sm:$0xff]  ;;  %v324_v2 = vld [vmem:[%s2174_s11 + $0x60] sm:$0xff] }
  0x32   : > { %v1258_v45 = vmax.f32 %v1186_v33, %v1222_v24  ;;  %v1079_v57 = vmax.f32 %v1007_v47, %v2270_v61  ;;  %v973_v60 = vld [vmem:[%s2179_s14 + $0x73] sm:$0xff]  ;;  %v828_v62 = vmax.f32 %v756_v50, %v792_v55  ;;  %v325_v3 = vld [vmem:[%s2174_s11 + $0x68] sm:$0xff]  ;;  %2000 = vmatprep.mubr.msk.f32.mxu0 %vm352_vm1, %v324_v2  ;;  %v1154_v10 = vld [vmem:[%s2179_s14 + $0x7d] sm:$0xff] }
  0x33   : > { %v1008_v58 = vmax.f32 %v936_v48, %v972_v43  ;;  %v1188_v0 = vmax.f32 %v1116_v51, %v1152_v42  ;;  %v937_v1 = vmax.f32 %v899_v54, %v865_v49  ;;  %v757_v4 = vld [vmem:[%s2179_s14 + $0x70] sm:$0xff]  ;;  %v974_v13 = vld [vmem:[%s2179_s14 + $0x7b] sm:$0xff]  ;;  %2001 = vmatmul.mubr.msk.f32.gmra.mrb[12].mxu0 %vm352_vm1, %v325_v3  ;;  %v1155_v24 = vld [vmem:[%s2179_s14 + $0x85] sm:$0xff] }
  0x34   : > { %2042 = vmatmul.mubr.msk.f32.gmra.mrb[4].mxu1 %vm352_vm1, %v1258_v45  ;;  %v1117_v5 = vmax.f32 %v1079_v57, %v1045_v52  ;;  %v1225_v61 = vld [vmem:[%s2179_s14 + $0x76] sm:$0xff]  ;;  %v900_v7 = vmax.f32 %v828_v62, %v864_v32  ;;  %v867_v18 = vld [vmem:[%s2179_s14 + $0x82] sm:$0xff]  ;;  %v868_v31 = vld [vmem:[%s2179_s14 + $0x8a] sm:$0xff] }
  0x35   : > { %2044 = vmatprep.mubr.msk.f32.mxu1 %vm352_vm1, %v1259_v40  ;;  %v1080_v6 = vmax.f32 %v1008_v58, %v1044_v26  ;;  %v793_v8 = vld [vmem:[%s2179_s14 + $0x71] sm:$0xff]  ;;  %v1260_v9 = vmax.f32 %v1188_v0, %v1224_v46  ;;  %v1009_v11 = vmax.f32 %v937_v1, %v973_v60  ;;  %v794_v20 = vld [vmem:[%s2179_s14 + $0x79] sm:$0xff]  ;;  %v975_v26 = vld [vmem:[%s2179_s14 + $0x83] sm:$0xff] }
  0x36   : > { %v829_v14 = vmax.f32 %v757_v4, %v793_v8  ;;  %v1189_v15 = vmax.f32 %v1117_v5, %v1153_v53  ;;  %v938_v17 = vmax.f32 %v900_v7, %v866_v63  ;;  %v758_v19 = vld [vmem:[%s2179_s14 + $0x78] sm:$0xff]  ;;  %v326_v32 = vld [vmem:[%s2174_s11 + $0x70] sm:$0xff]  ;;  %v759_v38 = vld [vmem:[%s2179_s14 + $0x80] sm:$0xff] }
  0x37   : > { %v1118_v16 = vmax.f32 %v1080_v6, %v2314_v59  ;;  %v1226_v21 = vld [vmem:[%s2179_s14 + $0x7e] sm:$0xff]  ;;  %v1081_v23 = vmax.f32 %v1009_v11, %v1045_v52  ;;  %v830_v27 = vmax.f32 %v758_v19, %v794_v20  ;;  %v1048_v35 = vld [vmem:[%s2179_s14 + $0x8c] sm:$0xff]  ;;  %2003 = vmatprep.mubr.msk.f32.mxu0 %vm352_vm1, %v326_v32  ;;  %v1049_v54 = vld [vmem:[%s2179_s14 + $0x94] sm:$0xff] }
  0x38   : > { %2045 = vmatmul.mubr.msk.f32.gmra.mrb[6].mxu1 %vm352_vm1, %v1260_v9  ;;  %v901_v25 = vmax.f32 %v829_v14, %v865_v49  ;;  %v1261_v28 = vmax.f32 %v1189_v15, %v1225_v61  ;;  %v1010_v30 = vmax.f32 %v938_v17, %v974_v13  ;;  %v327_v22 = vld [vmem:[%s2174_s11 + $0x78] sm:$0xff]  ;;  %v795_v39 = vld [vmem:[%s2179_s14 + $0x81] sm:$0xff]  ;;  %v1156_v43 = vld [vmem:[%s2179_s14 + $0x8d] sm:$0xff] }
  0x39   : > { %v1190_v29 = vmax.f32 %v1118_v16, %v1154_v10  ;;  %v1119_v33 = vmax.f32 %v1081_v23, %v2327_v12  ;;  %v902_v37 = vmax.f32 %v830_v27, %v866_v63  ;;  %v1227_v41 = vld [vmem:[%s2179_s14 + $0x86] sm:$0xff]  ;;  %2004 = vmatmul.mubr.msk.f32.gmra.mrb[14].mxu0 %vm352_vm1, %v327_v22  ;;  %v831_v45 = vmax.f32 %v759_v38, %v795_v39  ;;  %v1228_v47 = vld [vmem:[%s2179_s14 + $0x8e] sm:$0xff]  ;;  %v2361_v57 = vld [vmem:[%s2179_s14 + $0x9c] sm:$0xff] }
  0x3a   : > { %v939_v36 = vmax.f32 %v901_v25, %v867_v18  ;;  %2047 = vmatprep.mubr.msk.f32.mxu1 %vm352_vm1, %v1261_v28  ;;  %v1082_v42 = vmax.f32 %v1010_v30, %v2314_v59  ;;  %v976_v44 = vld [vmem:[%s2179_s14 + $0x8b] sm:$0xff]  ;;  %v1157_v55 = vld [vmem:[%s2179_s14 + $0x95] sm:$0xff]  ;;  %v328_v2 = vld [vmem:[%s2174_s11 + $0x80] sm:$0xff] }
  0x3b   : > { %v1262_v40 = vmax.f32 %v1190_v29, %v1226_v21  ;;  %v1191_v46 = vmax.f32 %v1119_v33, %v1155_v24  ;;  %v940_v49 = vmax.f32 %v902_v37, %v868_v31  ;;  %v869_v50 = vld [vmem:[%s2179_s14 + $0x92] sm:$0xff]  ;;  %v760_v51 = vld [vmem:[%s2179_s14 + $0x88] sm:$0xff]  ;;  %v903_v58 = vmax.f32 %v831_v45, %v867_v18  ;;  %v870_v1 = vld [vmem:[%s2179_s14 + $0x9a] sm:$0xff]  ;;  %2006 = vmatprep.mubr.msk.f32.mxu0 %vm352_vm1, %v328_v2 }
  0x3c   : > { %v1011_v48 = vmax.f32 %v939_v36, %v975_v26  ;;  %v796_v52 = vld [vmem:[%s2179_s14 + $0x89] sm:$0xff]  ;;  %v1120_v53 = vmax.f32 %v1082_v42, %v1048_v35  ;;  %v977_v0 = vld [vmem:[%s2179_s14 + $0x93] sm:$0xff]  ;;  %v1158_v11 = vld [vmem:[%s2179_s14 + $0x9d] sm:$0xff] }
  0x3d   : > { %2048 = vmatmul.mubr.msk.f32.gmra.mrb[8].mxu1 %vm352_vm1, %v1262_v40  ;;  %v832_v59 = vmax.f32 %v760_v51, %v796_v52  ;;  %v1263_v60 = vmax.f32 %v1191_v46, %v1227_v41  ;;  %v1012_v63 = vmax.f32 %v940_v49, %v976_v44  ;;  %v941_v4 = vmax.f32 %v903_v58, %v869_v50  ;;  %v329_v61 = vld [vmem:[%s2174_s11 + $0x88] sm:$0xff]  ;;  %v761_v6 = vld [vmem:[%s2179_s14 + $0x90] sm:$0xff]  ;;  %v1230_v15 = vld [vmem:[%s2179_s14 + $0x9e] sm:$0xff] }
  0x3e   : > { %v1083_v62 = vmax.f32 %v1011_v48, %v2327_v12  ;;  %v1192_v3 = vmax.f32 %v1120_v53, %v1156_v43  ;;  %v797_v7 = vld [vmem:[%s2179_s14 + $0x91] sm:$0xff]  ;;  %v978_v12 = vld [vmem:[%s2179_s14 + $0x9b] sm:$0xff]  ;;  %2007 = vmatmul.mubr.msk.f32.gmra.mrb[16].mxu0 %vm352_vm1, %v329_v61  ;;  %v1051_v23 = vld [vmem:[%s2179_s14 + $0xa4] sm:$0xff] }
  0x3f   : > { %v904_v5 = vmax.f32 %v832_v59, %v868_v31  ;;  %2050 = vmatprep.mubr.msk.f32.mxu1 %vm352_vm1, %v1263_v60  ;;  %v1229_v9 = vld [vmem:[%s2179_s14 + $0x96] sm:$0xff]  ;;  %v1084_v10 = vmax.f32 %v1012_v63, %v1048_v35  ;;  %v833_v13 = vmax.f32 %v761_v6, %v797_v7  ;;  %v1013_v16 = vmax.f32 %v941_v4, %v977_v0  ;;  %v871_v18 = vld [vmem:[%s2179_s14 + $0xa2] sm:$0xff]  ;;  %v2385_v29 = vld [vmem:[%s2179_s14 + $0xac] sm:$0xff] }
  0x40   : > { %v1121_v8 = vmax.f32 %v1083_v62, %v1049_v54  ;;  %v1264_v14 = vmax.f32 %v1192_v3, %v1228_v47  ;;  %v762_v19 = vld [vmem:[%s2179_s14 + $0x98] sm:$0xff]  ;;  %v1159_v24 = vld [vmem:[%s2179_s14 + $0xa5] sm:$0xff]  ;;  %v330_v36 = vld [vmem:[%s2174_s11 + $0x90] sm:$0xff] }
  0x41   : > { %v942_v17 = vmax.f32 %v904_v5, %v870_v1  ;;  %v1122_v21 = vmax.f32 %v1084_v10, %v2361_v57  ;;  %v905_v25 = vmax.f32 %v833_v13, %v869_v50  ;;  %v798_v26 = vld [vmem:[%s2179_s14 + $0x99] sm:$0xff]  ;;  %v1085_v27 = vmax.f32 %v1013_v16, %v1049_v54  ;;  %v979_v30 = vld [vmem:[%s2179_s14 + $0xa3] sm:$0xff]  ;;  %2009 = vmatprep.mubr.msk.f32.mxu0 %vm352_vm1, %v330_v36  ;;  %v1160_v45 = vld [vmem:[%s2179_s14 + $0xad] sm:$0xff] }
  0x42   : > { %v1193_v20 = vmax.f32 %v1121_v8, %v1157_v55  ;;  %2051 = vmatmul.mubr.msk.f32.gmra.mrb[10].mxu1 %vm352_vm1, %v1264_v14  ;;  %v834_v31 = vmax.f32 %v762_v19, %v798_v26  ;;  %v872_v32 = vld [vmem:[%s2179_s14 + $0xaa] sm:$0xff]  ;;  %v331_v37 = vld [vmem:[%s2174_s11 + $0x98] sm:$0xff]  ;;  %v763_v38 = vld [vmem:[%s2179_s14 + $0xa0] sm:$0xff] }
  0x43   : > { %v1014_v28 = vmax.f32 %v942_v17, %v978_v12  ;;  %v1194_v33 = vmax.f32 %v1122_v21, %v1158_v11  ;;  %v943_v35 = vmax.f32 %v905_v25, %v871_v18  ;;  %v1123_v39 = vmax.f32 %v1085_v27, %v1051_v23  ;;  %v1231_v40 = vld [vmem:[%s2179_s14 + $0xa6] sm:$0xff]  ;;  %v2399_v47 = vld [vmem:[%s2179_s14 + $0xb4] sm:$0xff]  ;;  %2010 = vmatmul.mubr.msk.f32.gmra.mrb[18].mxu0 %vm352_vm1, %v331_v37  ;;  %v1054_v6 = vld [vmem:[%s2179_s14 + $0xbc] sm:$0xff] }
  0x44   : > { %v1265_v22 = vmax.f32 %v1193_v20, %v1229_v9  ;;  %v906_v42 = vmax.f32 %v834_v31, %v870_v1  ;;  %v799_v43 = vld [vmem:[%s2179_s14 + $0xa1] sm:$0xff]  ;;  %v980_v48 = vld [vmem:[%s2179_s14 + $0xab] sm:$0xff]  ;;  %v1161_v59 = vld [vmem:[%s2179_s14 + $0xb5] sm:$0xff] }
  0x45   : > { %v1086_v41 = vmax.f32 %v1014_v28, %v2361_v57  ;;  %v1266_v44 = vmax.f32 %v1194_v33, %v1230_v15  ;;  %v1015_v46 = vmax.f32 %v943_v35, %v979_v30  ;;  %v835_v49 = vmax.f32 %v763_v38, %v799_v43  ;;  %v873_v53 = vld [vmem:[%s2179_s14 + $0xb2] sm:$0xff]  ;;  %v764_v54 = vld [vmem:[%s2179_s14 + $0xa8] sm:$0xff]  ;;  %v874_v3 = vld [vmem:[%s2179_s14 + $0xba] sm:$0xff] }
  0x46   : > { %2053 = vmatprep.mubr.msk.f32.mxu1 %vm352_vm1, %v1265_v22  ;;  %v1195_v50 = vmax.f32 %v1123_v39, %v1159_v24  ;;  %v944_v52 = vmax.f32 %v906_v42, %v872_v32  ;;  %v800_v55 = vld [vmem:[%s2179_s14 + $0xa9] sm:$0xff]  ;;  %v981_v62 = vld [vmem:[%s2179_s14 + $0xb3] sm:$0xff]  ;;  %v332_v4 = vld [vmem:[%s2174_s11 + $0xa0] sm:$0xff] }
  0x47   : > { %v1124_v51 = vmax.f32 %v1086_v41, %v2385_v29  ;;  %2054 = vmatmul.mubr.msk.f32.gmra.mrb[12].mxu1 %vm352_vm1, %v1266_v44  ;;  %v1232_v57 = vld [vmem:[%s2179_s14 + $0xae] sm:$0xff]  ;;  %v1087_v58 = vmax.f32 %v1015_v46, %v1051_v23  ;;  %v907_v60 = vmax.f32 %v835_v49, %v871_v18  ;;  %v836_v63 = vmax.f32 %v764_v54, %v800_v55  ;;  %v1233_v12 = vld [vmem:[%s2179_s14 + $0xb6] sm:$0xff]  ;;  %v1234_v18 = vld [vmem:[%s2179_s14 + $0xbe] sm:$0xff] }
  0x48   : > { %v1267_v0 = vmax.f32 %v1195_v50, %v1231_v40  ;;  %v1016_v2 = vmax.f32 %v944_v52, %v980_v48  ;;  %v333_v5 = vld [vmem:[%s2174_s11 + $0xa8] sm:$0xff]  ;;  %2012 = vmatprep.mubr.msk.f32.mxu0 %vm352_vm1, %v332_v4  ;;  %v765_v9 = vld [vmem:[%s2179_s14 + $0xb0] sm:$0xff]  ;;  %v1162_v14 = vld [vmem:[%s2179_s14 + $0xbd] sm:$0xff] }
  0x49   : > { %v1196_v1 = vmax.f32 %v1124_v51, %v1160_v45  ;;  %v1125_v61 = vmax.f32 %v1087_v58, %v2399_v47  ;;  %v945_v7 = vmax.f32 %v907_v60, %v873_v53  ;;  %v908_v8 = vmax.f32 %v836_v63, %v872_v32  ;;  %v801_v10 = vld [vmem:[%s2179_s14 + $0xb1] sm:$0xff]  ;;  %v982_v15 = vld [vmem:[%s2179_s14 + $0xbb] sm:$0xff]  ;;  %2013 = vmatmul.mubr.msk.f32.gmra.mrb[20].mxu0 %vm352_vm1, %v333_v5  ;;  %v1055_v26 = vld [vmem:[%s2179_s14 + $0xc4] sm:$0xff] }
  0x4a   : > { %2056 = vmatprep.mubr.msk.f32.mxu1 %vm352_vm1, %v1267_v0  ;;  %v1088_v13 = vmax.f32 %v1016_v2, %v2385_v29  ;;  %v837_v16 = vmax.f32 %v765_v9, %v801_v10  ;;  %v875_v21 = vld [vmem:[%s2179_s14 + $0xc2] sm:$0xff]  ;;  %v766_v23 = vld [vmem:[%s2179_s14 + $0xb8] sm:$0xff]  ;;  %v2433_v28 = vld [vmem:[%s2179_s14 + $0xcc] sm:$0xff] }
  0x4b   : > { %v1268_v11 = vmax.f32 %v1196_v1, %v1232_v57  ;;  %v1197_v17 = vmax.f32 %v1125_v61, %v1161_v59  ;;  %v1017_v19 = vmax.f32 %v945_v7, %v981_v62  ;;  %v946_v20 = vmax.f32 %v908_v8, %v874_v3  ;;  %v802_v24 = vld [vmem:[%s2179_s14 + $0xb9] sm:$0xff]  ;;  %v1163_v27 = vld [vmem:[%s2179_s14 + $0xc5] sm:$0xff]  ;;  %v334_v36 = vld [vmem:[%s2174_s11 + $0xb0] sm:$0xff] }
  0x4c   : > { %v1126_v25 = vmax.f32 %v1088_v13, %v1054_v6  ;;  %v909_v29 = vmax.f32 %v837_v16, %v873_v53  ;;  %v838_v30 = vmax.f32 %v766_v23, %v802_v24  ;;  %v983_v33 = vld [vmem:[%s2179_s14 + $0xc3] sm:$0xff]  ;;  %2015 = vmatprep.mubr.msk.f32.mxu0 %vm352_vm1, %v334_v36  ;;  %v335_v40 = vld [vmem:[%s2174_s11 + $0xb8] sm:$0xff]  ;;  %v1164_v46 = vld [vmem:[%s2179_s14 + $0xcd] sm:$0xff] }
  0x4d   : > { %2057 = vmatmul.mubr.msk.f32.gmra.mrb[14].mxu1 %vm352_vm1, %v1268_v11  ;;  %v1269_v31 = vmax.f32 %v1197_v17, %v1233_v12  ;;  %v1089_v32 = vmax.f32 %v1017_v19, %v2399_v47  ;;  %v1018_v22 = vmax.f32 %v946_v20, %v982_v15  ;;  %v876_v35 = vld [vmem:[%s2179_s14 + $0xca] sm:$0xff]  ;;  %v767_v41 = vld [vmem:[%s2179_s14 + $0xc0] sm:$0xff]  ;;  %2016 = vmatmul.mubr.msk.f32.gmra.mrb[22].mxu0 %vm352_vm1, %v335_v40  ;;  %v877_v53 = vld [vmem:[%s2179_s14 + $0xd2] sm:$0xff] }
  0x4e   : > { %v1198_v37 = vmax.f32 %v1126_v25, %v1162_v14  ;;  %v947_v38 = vmax.f32 %v909_v29, %v875_v21  ;;  %v910_v39 = vmax.f32 %v838_v30, %v874_v3  ;;  %v803_v42 = vld [vmem:[%s2179_s14 + $0xc1] sm:$0xff]  ;;  %v984_v47 = vld [vmem:[%s2179_s14 + $0xcb] sm:$0xff]  ;;  %v1057_v58 = vld [vmem:[%s2179_s14 + $0xd4] sm:$0xff] }
  0x4f   : > { %2059 = vmatprep.mubr.msk.f32.mxu1 %vm352_vm1, %v1269_v31  ;;  %v1127_v43 = vmax.f32 %v1089_v32, %v1055_v26  ;;  %v1235_v44 = vld [vmem:[%s2179_s14 + $0xc6] sm:$0xff]  ;;  %v1090_v45 = vmax.f32 %v1018_v22, %v1054_v6  ;;  %v839_v48 = vmax.f32 %v767_v41, %v803_v42  ;;  %v1236_v50 = vld [vmem:[%s2179_s14 + $0xce] sm:$0xff]  ;;  %v2457_v1 = vld [vmem:[%s2179_s14 + $0xdc] sm:$0xff] }
  0x50   : > { %v1270_v49 = vmax.f32 %v1198_v37, %v1234_v18  ;;  %v1019_v51 = vmax.f32 %v947_v38, %v983_v33  ;;  %v948_v52 = vmax.f32 %v910_v39, %v876_v35  ;;  %v768_v54 = vld [vmem:[%s2179_s14 + $0xc8] sm:$0xff]  ;;  %v1165_v59 = vld [vmem:[%s2179_s14 + $0xd5] sm:$0xff]  ;;  %v336_v7 = vld [vmem:[%s2174_s11 + $0xc0] sm:$0xff] }
  0x51   : > { %v1199_v55 = vmax.f32 %v1127_v43, %v1163_v27  ;;  %v1128_v57 = vmax.f32 %v1090_v45, %v2433_v28  ;;  %v911_v60 = vmax.f32 %v839_v48, %v875_v21  ;;  %v804_v62 = vld [vmem:[%s2179_s14 + $0xc9] sm:$0xff]  ;;  %v985_v2 = vld [vmem:[%s2179_s14 + $0xd3] sm:$0xff]  ;;  %2018 = vmatprep.mubr.msk.f32.mxu0 %vm352_vm1, %v336_v7  ;;  %v1166_v16 = vld [vmem:[%s2179_s14 + $0xdd] sm:$0xff] }
  0x52   : > { %2060 = vmatmul.mubr.msk.f32.gmra.mrb[16].mxu1 %vm352_vm1, %v1270_v49  ;;  %v1091_v63 = vmax.f32 %v1019_v51, %v1055_v26  ;;  %v1020_v0 = vmax.f32 %v948_v52, %v984_v47  ;;  %v840_v3 = vmax.f32 %v768_v54, %v804_v62  ;;  %v878_v4 = vld [vmem:[%s2179_s14 + $0xda] sm:$0xff]  ;;  %v337_v8 = vld [vmem:[%s2174_s11 + $0xc8] sm:$0xff]  ;;  %v769_v9 = vld [vmem:[%s2179_s14 + $0xd0] sm:$0xff] }
  0x53   : > { %v1271_v5 = vmax.f32 %v1199_v55, %v1235_v44  ;;  %v1200_v61 = vmax.f32 %v1128_v57, %v1164_v46  ;;  %v949_v6 = vmax.f32 %v911_v60, %v877_v53  ;;  %v1237_v11 = vld [vmem:[%s2179_s14 + $0xd6] sm:$0xff]  ;;  %v2471_v18 = vld [vmem:[%s2179_s14 + $0xe4] sm:$0xff]  ;;  %2019 = vmatmul.mubr.msk.f32.gmra.mrb[24].mxu0 %vm352_vm1, %v337_v8  ;;  %v1060_v41 = vld [vmem:[%s2179_s14 + $0xec] sm:$0xff] }
  0x54   : > { %v1129_v10 = vmax.f32 %v1091_v63, %v1057_v58  ;;  %v1092_v12 = vmax.f32 %v1020_v0, %v2433_v28  ;;  %v912_v13 = vmax.f32 %v840_v3, %v876_v35  ;;  %v805_v14 = vld [vmem:[%s2179_s14 + $0xd1] sm:$0xff]  ;;  %v986_v19 = vld [vmem:[%s2179_s14 + $0xdb] sm:$0xff]  ;;  %v1167_v30 = vld [vmem:[%s2179_s14 + $0xe5] sm:$0xff] }
  0x55   : > { %2062 = vmatprep.mubr.msk.f32.mxu1 %vm352_vm1, %v1271_v5  ;;  %v1272_v15 = vmax.f32 %v1200_v61, %v1236_v50  ;;  %v1021_v17 = vmax.f32 %v949_v6, %v985_v2  ;;  %v841_v20 = vmax.f32 %v769_v9, %v805_v14  ;;  %v879_v25 = vld [vmem:[%s2179_s14 + $0xe2] sm:$0xff]  ;;  %v770_v26 = vld [vmem:[%s2179_s14 + $0xd8] sm:$0xff]  ;;  %v880_v37 = vld [vmem:[%s2179_s14 + $0xea] sm:$0xff] }
  0x56   : > { %v1201_v21 = vmax.f32 %v1129_v10, %v1165_v59  ;;  %v1130_v23 = vmax.f32 %v1092_v12, %v2457_v1  ;;  %v950_v24 = vmax.f32 %v912_v13, %v878_v4  ;;  %v806_v27 = vld [vmem:[%s2179_s14 + $0xd9] sm:$0xff]  ;;  %v987_v32 = vld [vmem:[%s2179_s14 + $0xe3] sm:$0xff]  ;;  %v338_v38 = vld [vmem:[%s2174_s11 + $0xd0] sm:$0xff] }
  0x57   : > { %2063 = vmatmul.mubr.msk.f32.gmra.mrb[18].mxu1 %vm352_vm1, %v1272_v15  ;;  %v1238_v28 = vld [vmem:[%s2179_s14 + $0xde] sm:$0xff]  ;;  %v1093_v29 = vmax.f32 %v1021_v17, %v1057_v58  ;;  %v913_v31 = vmax.f32 %v841_v20, %v877_v53  ;;  %v842_v22 = vmax.f32 %v770_v26, %v806_v27  ;;  %2021 = vmatprep.mubr.msk.f32.mxu0 %vm352_vm1, %v338_v38  ;;  %v1239_v47 = vld [vmem:[%s2179_s14 + $0xe6] sm:$0xff]  ;;  %v1240_v53 = vld [vmem:[%s2179_s14 + $0xee] sm:$0xff] }
  0x58   : > { %v1273_v33 = vmax.f32 %v1201_v21, %v1237_v11  ;;  %v1202_v35 = vmax.f32 %v1130_v23, %v1166_v16  ;;  %v1022_v36 = vmax.f32 %v950_v24, %v986_v19  ;;  %v339_v39 = vld [vmem:[%s2174_s11 + $0xd8] sm:$0xff]  ;;  %v771_v44 = vld [vmem:[%s2179_s14 + $0xe0] sm:$0xff]  ;;  %v1168_v49 = vld [vmem:[%s2179_s14 + $0xed] sm:$0xff] }
  0x59   : > { %v1131_v40 = vmax.f32 %v1093_v29, %v2471_v18  ;;  %v951_v42 = vmax.f32 %v913_v31, %v879_v25  ;;  %v914_v43 = vmax.f32 %v842_v22, %v878_v4  ;;  %v807_v45 = vld [vmem:[%s2179_s14 + $0xe1] sm:$0xff]  ;;  %v988_v50 = vld [vmem:[%s2179_s14 + $0xeb] sm:$0xff]  ;;  %2022 = vmatmul.mubr.msk.f32.gmra.mrb[26].mxu0 %vm352_vm1, %v339_v39  ;;  %v1061_v62 = vld [vmem:[%s2179_s14 + $0xf4] sm:$0xff] }
  0x5a   : > { %2065 = vmatprep.mubr.msk.f32.mxu1 %vm352_vm1, %v1273_v33  ;;  %v1274_v46 = vmax.f32 %v1202_v35, %v1238_v28  ;;  %v1094_v48 = vmax.f32 %v1022_v36, %v2457_v1  ;;  %v843_v51 = vmax.f32 %v771_v44, %v807_v45  ;;  %v881_v57 = vld [vmem:[%s2179_s14 + $0xf2] sm:$0xff]  ;;  %v772_v58 = vld [vmem:[%s2179_s14 + $0xe8] sm:$0xff]  ;;  %v2505_v0 = vld [vmem:[%s2179_s14 + $0xfc] sm:$0xff] }
  0x5b   : > { %v1203_v52 = vmax.f32 %v1131_v40, %v1167_v30  ;;  %v1023_v54 = vmax.f32 %v951_v42, %v987_v32  ;;  %v952_v55 = vmax.f32 %v914_v43, %v880_v37  ;;  %v808_v59 = vld [vmem:[%s2179_s14 + $0xe9] sm:$0xff]  ;;  %v1169_v63 = vld [vmem:[%s2179_s14 + $0xf5] sm:$0xff]  ;;  %v340_v7 = vld [vmem:[%s2174_s11 + $0xe0] sm:$0xff] }
  0x5c   : > { %2066 = vmatmul.mubr.msk.f32.gmra.mrb[20].mxu1 %vm352_vm1, %v1274_v46  ;;  %v1132_v60 = vmax.f32 %v1094_v48, %v1060_v41  ;;  %v915_v1 = vmax.f32 %v843_v51, %v879_v25  ;;  %v844_v2 = vmax.f32 %v772_v58, %v808_v59  ;;  %v989_v61 = vld [vmem:[%s2179_s14 + $0xf3] sm:$0xff]  ;;  %2024 = vmatprep.mubr.msk.f32.mxu0 %vm352_vm1, %v340_v7  ;;  %v341_v11 = vld [vmem:[%s2174_s11 + $0xe8] sm:$0xff]  ;;  %v1170_v17 = vld [vmem:[%s2179_s14 + $0xfd] sm:$0xff] }
  0x5d   : > { %v1275_v3 = vmax.f32 %v1203_v52, %v1239_v47  ;;  %v1095_v4 = vmax.f32 %v1023_v54, %v2471_v18  ;;  %v1024_v5 = vmax.f32 %v952_v55, %v988_v50  ;;  %v882_v6 = vld [vmem:[%s2179_s14 + $0xfa] sm:$0xff]  ;;  %v773_v12 = vld [vmem:[%s2179_s14 + $0xf0] sm:$0xff]  ;;  %2025 = vmatmul.mubr.msk.f32.gmra.mrb[28].mxu0 %vm352_vm1, %v341_v11  ;;  %v883_v25 = vld [vmem:[%s2179_s14 + $0x102] sm:$0xff] }
  0x5e   : > { %v1204_v8 = vmax.f32 %v1132_v60, %v1168_v49  ;;  %v953_v9 = vmax.f32 %v915_v1, %v881_v57  ;;  %v916_v10 = vmax.f32 %v844_v2, %v880_v37  ;;  %v809_v13 = vld [vmem:[%s2179_s14 + $0xf1] sm:$0xff]  ;;  %v990_v18 = vld [vmem:[%s2179_s14 + $0xfb] sm:$0xff]  ;;  %v1063_v30 = vld [vmem:[%s2179_s14 + $0x104] sm:$0xff] }
  0x5f   : > { %2068 = vmatprep.mubr.msk.f32.mxu1 %vm352_vm1, %v1275_v3  ;;  %v1133_v14 = vmax.f32 %v1095_v4, %v1061_v62  ;;  %v1241_v15 = vld [vmem:[%s2179_s14 + $0xf6] sm:$0xff]  ;;  %v1096_v16 = vmax.f32 %v1024_v5, %v1060_v41  ;;  %v845_v19 = vmax.f32 %v773_v12, %v809_v13  ;;  %v1242_v21 = vld [vmem:[%s2179_s14 + $0xfe] sm:$0xff]  ;;  %v2524_v27 = vld [vmem:[%s2179_s14 + $0x2d] sm:$0xff] }
  0x60   : > { %v1276_v20 = vmax.f32 %v1204_v8, %v1240_v53  ;;  %v1025_v23 = vmax.f32 %v953_v9, %v989_v61  ;;  %v954_v24 = vmax.f32 %v916_v10, %v882_v6  ;;  %v774_v26 = vld [vmem:[%s2179_s14 + $0xf8] sm:$0xff]  ;;  %v1171_v31 = vld [vmem:[%s2179_s14 + $0x105] sm:$0xff]  ;;  %v342_v43 = vld [vmem:[%s2174_s11 + $0xf0] sm:$0xff]  ;;  %v1180_v59 = vmax.f32 %v2251_v34, %v2524_v27 }
  0x61   : > { %v1205_v28 = vmax.f32 %v1133_v14, %v1169_v63  ;;  %v1134_v29 = vmax.f32 %v1096_v16, %v2505_v0  ;;  %v917_v32 = vmax.f32 %v845_v19, %v881_v57  ;;  %v810_v22 = vld [vmem:[%s2179_s14 + $0xf9] sm:$0xff]  ;;  %v2532_v36 = vld [vmem:[%s2179_s14 + $0x10c] sm:$0xff]  ;;  %v991_v37 = vld [vmem:[%s2179_s14 + $0x103] sm:$0xff]  ;;  %2027 = vmatprep.mubr.msk.f32.mxu0 %vm352_vm1, %v342_v43 }
  0x62   : > { %2069 = vmatmul.mubr.msk.f32.gmra.mrb[22].mxu1 %vm352_vm1, %v1276_v20  ;;  %v1097_v33 = vmax.f32 %v1025_v23, %v1061_v62  ;;  %v1026_v35 = vmax.f32 %v954_v24, %v990_v18  ;;  %v846_v38 = vmax.f32 %v774_v26, %v810_v22  ;;  %v884_v39 = vld [vmem:[%s2179_s14 + $0x10a] sm:$0xff]  ;;  %v343_v44 = vld [vmem:[%s2174_s11 + $0xf8] sm:$0xff]  ;;  %v775_v45 = vld [vmem:[%s2179_s14 + $0x100] sm:$0xff] }
  0x63   : > { %v1277_v40 = vmax.f32 %v1205_v28, %v1241_v15  ;;  %v1206_v41 = vmax.f32 %v1134_v29, %v1170_v17  ;;  %v955_v42 = vmax.f32 %v917_v32, %v883_v25  ;;  %v1243_v47 = vld [vmem:[%s2179_s14 + $0x106] sm:$0xff]  ;;  %v1244_v53 = vld [vmem:[%s2179_s14 + $0x10e] sm:$0xff]  ;;  %2028 = vmatmul.mubr.msk.f32.gmra.mrb[30].mxu0 %vm352_vm1, %v343_v44  ;;  %v1066_v5 = vld [vmem:[%s2179_s14 + $0x11c] sm:$0xff] }
  0x64   : > { %v1135_v46 = vmax.f32 %v1097_v33, %v1063_v30  ;;  %v1098_v48 = vmax.f32 %v1026_v35, %v2505_v0  ;;  %v1172_v49 = vld [vmem:[%s2179_s14 + $0x10d] sm:$0xff]  ;;  %v918_v50 = vmax.f32 %v846_v38, %v882_v6  ;;  %v811_v51 = vld [vmem:[%s2179_s14 + $0x101] sm:$0xff]  ;;  %v1173_v4 = vld [vmem:[%s2179_s14 + $0x115] sm:$0xff] }
  0x65   : > { %2071 = vmatprep.mubr.msk.f32.mxu1 %vm352_vm1, %v1277_v40  ;;  %v1278_v52 = vmax.f32 %v1206_v41, %v1242_v21  ;;  %v1027_v54 = vmax.f32 %v955_v42, %v991_v37  ;;  %v2547_v55 = vld [vmem:[%s2179_s14 + $0x114] sm:$0xff]  ;;  %v992_v57 = vld [vmem:[%s2179_s14 + $0x10b] sm:$0xff]  ;;  %v847_v58 = vmax.f32 %v775_v45, %v811_v51  ;;  %v1174_v28 = vld [vmem:[%s2179_s14 + $0x11d] sm:$0xff] }
  0x66   : > { %v1207_v60 = vmax.f32 %v1135_v46, %v1171_v31  ;;  %v1136_v62 = vmax.f32 %v1098_v48, %v2532_v36  ;;  %v956_v63 = vmax.f32 %v918_v50, %v884_v39  ;;  %v885_v0 = vld [vmem:[%s2179_s14 + $0x112] sm:$0xff]  ;;  %v776_v1 = vld [vmem:[%s2179_s14 + $0x108] sm:$0xff]  ;;  %v886_v10 = vld [vmem:[%s2179_s14 + $0x11a] sm:$0xff] }
  0x67   : > { %v812_v2 = vld [vmem:[%s2179_s14 + $0x109] sm:$0xff]  ;;  %2072 = vmatmul.mubr.msk.f32.gmra.mrb[24].mxu1 %vm352_vm1, %v1278_v52  ;;  %v1099_v3 = vmax.f32 %v1027_v54, %v1063_v30  ;;  %v919_v61 = vmax.f32 %v847_v58, %v883_v25  ;;  %v993_v34 = vld [vmem:[%s2179_s14 + $0x113] sm:$0xff]  ;;  %v994_v24 = vld [vmem:[%s2179_s14 + $0x11b] sm:$0xff] }
  0x68   : > { %v848_v6 = vmax.f32 %v776_v1, %v812_v2  ;;  %v1279_v7 = vmax.f32 %v1207_v60, %v1243_v47  ;;  %v1208_v8 = vmax.f32 %v1136_v62, %v1172_v49  ;;  %v1028_v9 = vmax.f32 %v956_v63, %v992_v57  ;;  %v1143_v11 = vld [vmem:[%s2179_s14 + $0x25] sm:$0xff]  ;;  %v1216_v17 = vld [vmem:[%s2179_s14 + $0x2e] sm:$0xff]  ;;  %v1245_v21 = vld [vmem:[%s2179_s14 + $0x116] sm:$0xff] }
  0x69   : > { %v1215_v12 = vld [vmem:[%s2179_s14 + $0x26] sm:$0xff]  ;;  %v1137_v13 = vmax.f32 %v1099_v3, %v2547_v55  ;;  %v957_v14 = vmax.f32 %v919_v61, %v885_v0  ;;  %v1179_v16 = vmax.f32 %v2221_v56, %v1143_v11  ;;  %v777_v18 = vld [vmem:[%s2179_s14 + $0x110] sm:$0xff]  ;;  %v1252_v25 = vmax.f32 %v1180_v59, %v1216_v17  ;;  %v778_v32 = vld [vmem:[%s2179_s14 + $0x118] sm:$0xff] }
  0x6a   : > { %v920_v15 = vmax.f32 %v848_v6, %v884_v39  ;;  %v813_v19 = vld [vmem:[%s2179_s14 + $0x111] sm:$0xff]  ;;  %2074 = vmatprep.mubr.msk.f32.mxu1 %vm352_vm1, %v1279_v7  ;;  %v1280_v20 = vmax.f32 %v1208_v8, %v1244_v53  ;;  %v1100_v23 = vmax.f32 %v1028_v9, %v2532_v36  ;;  %v923_v31 = vld [vmem:[%s2179_s14 + $0x122] sm:$0xff]  ;;  %v814_v36 = vld [vmem:[%s2179_s14 + $0x119] sm:$0xff] }
  0x6b   : > { %v849_v26 = vmax.f32 %v777_v18, %v813_v19  ;;  %v1209_v27 = vmax.f32 %v1137_v13, %v1173_v4  ;;  %v1029_v56 = vmax.f32 %v957_v14, %v993_v34  ;;  %v1251_v30 = vmax.f32 %v1179_v16, %v1215_v12  ;;  %v1067_v33 = vld [vmem:[%s2179_s14 + $0x124] sm:$0xff]  ;;  %v1068_v45 = vld [vmem:[%s2179_s14 + $0x12c] sm:$0xff]  ;;  %v1105_v59 = vld [vmem:[%s2179_s14 + $0x134] sm:$0xff] }
  0x6c   : > { %v958_v29 = vmax.f32 %v920_v15, %v886_v10  ;;  %2075 = vmatmul.mubr.msk.f32.gmra.mrb[26].mxu1 %vm352_vm1, %v1280_v20  ;;  %v1138_v22 = vmax.f32 %v1100_v23, %v1066_v5  ;;  %v1246_v38 = vld [vmem:[%s2179_s14 + $0x11e] sm:$0xff]  ;;  %v850_v42 = vmax.f32 %v778_v32, %v814_v36  ;;  %v924_v47 = vld [vmem:[%s2179_s14 + $0x12a] sm:$0xff]  ;;  %v1177_v2 = vld [vmem:[%s2179_s14 + $0x135] sm:$0xff] }
  0x6d   : > { %v921_v35 = vmax.f32 %v849_v26, %v885_v0  ;;  %v1281_v37 = vmax.f32 %v1209_v27, %v1245_v21  ;;  %v1101_v39 = vmax.f32 %v1029_v56, %v2547_v55  ;;  %2032 = vmatprep.mubr.msk.f32.mxu0 %vm352_vm1, %v1251_v30  ;;  %v995_v41 = vld [vmem:[%s2179_s14 + $0x123] sm:$0xff]  ;;  %v1176_v53 = vld [vmem:[%s2179_s14 + $0x12d] sm:$0xff]  ;;  %v1249_v34 = vld [vmem:[%s2179_s14 + $0x136] sm:$0xff] }
  0x6e   : > { %v1030_v40 = vmax.f32 %v958_v29, %v994_v24  ;;  %v1210_v43 = vmax.f32 %v1138_v22, %v1174_v28  ;;  %v1175_v44 = vld [vmem:[%s2179_s14 + $0x125] sm:$0xff]  ;;  %2033 = vmatmul.mubr.msk.f32.vlgmr.msra.gmra.mrb[32].mxu0 %vm352_vm1, %v1252_v25  ;;  %v922_v50 = vmax.f32 %v850_v42, %v886_v10  ;;  %v1248_v62 = vld [vmem:[%s2179_s14 + $0x12e] sm:$0xff]  ;;  %v1178_v8 = vld [vmem:[%s2179_s14 + $0x13d] sm:$0xff] }
  0x6f   : > { %v959_v46 = vmax.f32 %v921_v35, %v923_v31  ;;  %2077 = vmatprep.mubr.msk.f32.mxu1 %vm352_vm1, %v1281_v37  ;;  %v1139_v48 = vmax.f32 %v1101_v39, %v1067_v33  ;;  %v1247_v52 = vld [vmem:[%s2179_s14 + $0x126] sm:$0xff]  ;;  %v1250_v11 = vld [vmem:[%s2179_s14 + $0x13e] sm:$0xff] }
  0x70   : > { %v1102_v49 = vmax.f32 %v1030_v40, %v1066_v5  ;;  %v1282_v51 = vmax.f32 %v1210_v43, %v1246_v38  ;;  %v996_v55 = vld [vmem:[%s2179_s14 + $0x12b] sm:$0xff]  ;;  %v960_v60 = vmax.f32 %v922_v50, %v924_v47  ;;  %v1106_v5 = vld [vmem:[%s2179_s14 + $0x13c] sm:$0xff] }
  0x71   : > { %v1031_v54 = vmax.f32 %v959_v46, %v995_v41  ;;  %v1211_v57 = vmax.f32 %v1139_v48, %v1175_v44  ;;  %v2606_v14 = vld [vmem:[%s2836_s3] ss:$0 sm:$0xff] }
  0x72   : > { %v1140_v58 = vmax.f32 %v1102_v49, %v1068_v45  ;;  %2078 = vmatmul.mubr.msk.f32.gmra.mrb[28].mxu1 %vm352_vm1, %v1282_v51  ;;  %v1032_v3 = vmax.f32 %v960_v60, %v996_v55  ;;  %v2636_v36 = vld [vmem:[%s2838_s5] ss:$0 sm:$0xff] }
  0x73   : > { %v1103_v63 = vmax.f32 %v1031_v54, %v1067_v33  ;;  %v1283_v0 = vmax.f32 %v1211_v57, %v1247_v52 }
  0x74   : > { %v1212_v1 = vmax.f32 %v1140_v58, %v1176_v53  ;;  %v1104_v6 = vmax.f32 %v1032_v3, %v1068_v45 }
  0x75   : > { %v1141_v4 = vmax.f32 %v1103_v63, %v1105_v59  ;;  %2080 = vmatprep.mubr.msk.f32.mxu1 %vm352_vm1, %v1283_v0 }
  0x76   : > { %v1284_v61 = vmax.f32 %v1212_v1, %v1248_v62  ;;  %v1142_v9 = vmax.f32 %v1104_v6, %v1106_v5 }
  0x77   : > { %v1213_v7 = vmax.f32 %v1141_v4, %v1177_v2 }
  0x78   : > { %2081 = vmatmul.mubr.msk.f32.gmra.mrb[30].mxu1 %vm352_vm1, %v1284_v61  ;;  %v1214_v12 = vmax.f32 %v1142_v9, %v1178_v8 }
  0x79   : > { %v1285_v10 = vmax.f32 %v1213_v7, %v1249_v34 }
  0x7a   : > { %v1286_v13 = vmax.f32 %v1214_v12, %v1250_v11 }
  0x7b   : > { %2083 = vmatprep.mubr.msk.f32.mxu1 %vm352_vm1, %v1285_v10 }
  0x7c   : > { %2084 = vmatmul.mubr.msk.f32.gmra.mrb[32].mxu1 %vm352_vm1, %v1286_v13 }
  0xe5   : > { %v1984_v15 = vpop.f32.mrb[0].mxu0 }
  0xe6   : > { %v525_v16 = vadd.f32 %v1984_v15, %v2606_v14  ;;  %v519_v17 = vpop.f32.mrb[1].mxu0 }
  0xe7   : > { %v520_v18 = vadd.f32 %v2606_v14, %v519_v17 }
  0xe8   : > { %v679_v19 = vmax.f32 %v525_v16, 0.0 }
  0xe9   : > { %v678_v20 = vmax.f32 %v520_v18, 0.0 }
  0xea   : > { %712 = vst.msk [vmem:[%s2614_s19 + $0x8] sm:$0xff] %vm710_vm2, %v679_v19 }
  0xeb   : > { %711 = vst.msk [vmem:[%s2614_s19] sm:$0xff] %vm710_vm2, %v678_v20 }
  0xf0   : > { %v1987_v21 = vpop.f32.mrb[2].mxu0 }
  0xf1   : > { %v535_v23 = vadd.f32 %v1987_v21, %v2606_v14  ;;  %v529_v24 = vpop.f32.mrb[3].mxu0 }
  0xf2   : > { %v530_v25 = vadd.f32 %v2606_v14, %v529_v24 }
  0xf3   : > { %v681_v26 = vmax.f32 %v535_v23, 0.0 }
  0xf4   : > { %v680_v27 = vmax.f32 %v530_v25, 0.0  ;;  %v1990_v28 = vpop.f32.mrb[4].mxu0 }
  0xf5   : > { %714 = vst.msk [vmem:[%s2614_s19 + $0x18] sm:$0xff] %vm710_vm2, %v681_v26  ;;  %v545_v56 = vadd.f32 %v1990_v28, %v2606_v14  ;;  %v539_v29 = vpop.f32.mrb[5].mxu0 }
  0xf6   : > { %713 = vst.msk [vmem:[%s2614_s19 + $0x10] sm:$0xff] %vm710_vm2, %v680_v27  ;;  %v540_v30 = vadd.f32 %v2606_v14, %v539_v29 }
  0xf7   : > { %v683_v31 = vmax.f32 %v545_v56, 0.0 }
  0xf8   : > { %v682_v32 = vmax.f32 %v540_v30, 0.0 }
  0xf9   : > { %716 = vst.msk [vmem:[%s2614_s19 + $0x28] sm:$0xff] %vm710_vm2, %v683_v31 }
  0xfa   : > { %v1993_v22 = vpop.f32.mrb[6].mxu0  ;;  %715 = vst.msk [vmem:[%s2614_s19 + $0x20] sm:$0xff] %vm710_vm2, %v682_v32 }
  0xfb   : > { %v555_v33 = vadd.f32 %v1993_v22, %v2606_v14  ;;  %v549_v35 = vpop.f32.mrb[7].mxu0 }
  0xfc   : > { %v550_v37 = vadd.f32 %v2606_v14, %v549_v35  ;;  %v2037_v39 = vpop.f32.mrb[0].mxu1 }
  0xfd   : > { %v685_v38 = vmax.f32 %v555_v33, 0.0  ;;  %v1488_v41 = vadd.f32 %v2037_v39, %v2636_v36  ;;  %v1482_v42 = vpop.f32.mrb[1].mxu1 }
  0xfe   : > { %v684_v40 = vmax.f32 %v550_v37, 0.0  ;;  %v1996_v43 = vpop.f32.mrb[8].mxu0  ;;  %v1483_v44 = vadd.f32 %v2636_v36, %v1482_v42 }
  0xff   : > { %718 = vst.msk [vmem:[%s2614_s19 + $0x38] sm:$0xff] %vm710_vm2, %v685_v38  ;;  %v565_v45 = vadd.f32 %v1996_v43, %v2606_v14  ;;  %v559_v46 = vpop.f32.mrb[9].mxu0  ;;  %v1654_v47 = vmax.f32 %v1488_v41, 0.0 }
 0x100   : > { %717 = vst.msk [vmem:[%s2614_s19 + $0x30] sm:$0xff] %vm710_vm2, %v684_v40  ;;  %v560_v48 = vadd.f32 %v2606_v14, %v559_v46  ;;  %v1653_v49 = vmax.f32 %v1483_v44, 0.0  ;;  %v2040_v51 = vpop.f32.mrb[2].mxu1 }
 0x101   : > { %v687_v50 = vmax.f32 %v565_v45, 0.0  ;;  %1690 = vst.msk [vmem:[%s2647_s26 + $0x18] sm:$0xff] %vm352_vm1, %v1654_v47  ;;  %v1498_v53 = vadd.f32 %v2040_v51, %v2636_v36  ;;  %v1492_v54 = vpop.f32.mrb[3].mxu1 }
 0x102   : > { %v686_v52 = vmax.f32 %v560_v48, 0.0  ;;  %1689 = vst.msk [vmem:[%s2647_s26 + $0x10] sm:$0xff] %vm352_vm1, %v1653_v49  ;;  %v1999_v55 = vpop.f32.mrb[10].mxu0  ;;  %v1493_v57 = vadd.f32 %v2636_v36, %v1492_v54 }
 0x103   : > { %720 = vst.msk [vmem:[%s2614_s19 + $0x48] sm:$0xff] %vm710_vm2, %v687_v50  ;;  %v575_v58 = vadd.f32 %v1999_v55, %v2606_v14  ;;  %v569_v59 = vpop.f32.mrb[11].mxu0  ;;  %v1656_v60 = vmax.f32 %v1498_v53, 0.0 }
 0x104   : > { %719 = vst.msk [vmem:[%s2614_s19 + $0x40] sm:$0xff] %vm710_vm2, %v686_v52  ;;  %v570_v62 = vadd.f32 %v2606_v14, %v569_v59  ;;  %v1655_v63 = vmax.f32 %v1493_v57, 0.0 }
 0x105   : > { %v689_v1 = vmax.f32 %v575_v58, 0.0  ;;  %1692 = vst.msk [vmem:[%s2647_s26 + $0x28] sm:$0xff] %vm352_vm1, %v1656_v60 }
 0x106   : > { %v688_v4 = vmax.f32 %v570_v62, 0.0  ;;  %1691 = vst.msk [vmem:[%s2647_s26 + $0x20] sm:$0xff] %vm352_vm1, %v1655_v63  ;;  %v2002_v34 = vpop.f32.mrb[12].mxu0 }
 0x107   : > { %v2043_v0 = vpop.f32.mrb[4].mxu1  ;;  %722 = vst.msk [vmem:[%s2614_s19 + $0x58] sm:$0xff] %vm710_vm2, %v689_v1  ;;  %v585_v7 = vadd.f32 %v2002_v34, %v2606_v14  ;;  %v579_v8 = vpop.f32.mrb[13].mxu0 }
 0x108   : > { %v1508_v2 = vadd.f32 %v2043_v0, %v2636_v36  ;;  %v1502_v3 = vpop.f32.mrb[5].mxu1  ;;  %721 = vst.msk [vmem:[%s2614_s19 + $0x50] sm:$0xff] %vm710_vm2, %v688_v4  ;;  %v580_v10 = vadd.f32 %v2606_v14, %v579_v8 }
 0x109   : > { %v1503_v5 = vadd.f32 %v2636_v36, %v1502_v3  ;;  %v691_v13 = vmax.f32 %v585_v7, 0.0 }
 0x10a   : > { %v1658_v61 = vmax.f32 %v1508_v2, 0.0  ;;  %v690_v16 = vmax.f32 %v580_v10, 0.0 }
 0x10b   : > { %v1657_v6 = vmax.f32 %v1503_v5, 0.0  ;;  %v2046_v9 = vpop.f32.mrb[6].mxu1  ;;  %724 = vst.msk [vmem:[%s2614_s19 + $0x68] sm:$0xff] %vm710_vm2, %v691_v13 }
 0x10c   : > { %1694 = vst.msk [vmem:[%s2647_s26 + $0x38] sm:$0xff] %vm352_vm1, %v1658_v61  ;;  %v1518_v11 = vadd.f32 %v2046_v9, %v2636_v36  ;;  %v1512_v12 = vpop.f32.mrb[7].mxu1  ;;  %v2005_v18 = vpop.f32.mrb[14].mxu0 }
 0x10d   : > { %1693 = vst.msk [vmem:[%s2647_s26 + $0x30] sm:$0xff] %vm352_vm1, %v1657_v6  ;;  %v1513_v15 = vadd.f32 %v2636_v36, %v1512_v12  ;;  %v595_v20 = vadd.f32 %v2005_v18, %v2606_v14  ;;  %v589_v21 = vpop.f32.mrb[15].mxu0 }
 0x10e   : > { %v1660_v17 = vmax.f32 %v1518_v11, 0.0  ;;  %723 = vst.msk [vmem:[%s2614_s19 + $0x60] sm:$0xff] %vm710_vm2, %v690_v16  ;;  %v590_v24 = vadd.f32 %v2606_v14, %v589_v21 }
 0x10f   : > { %v1659_v19 = vmax.f32 %v1513_v15, 0.0  ;;  %v693_v27 = vmax.f32 %v595_v20, 0.0 }
 0x110   : > { %1696 = vst.msk [vmem:[%s2647_s26 + $0x48] sm:$0xff] %vm352_vm1, %v1660_v17  ;;  %v2049_v23 = vpop.f32.mrb[8].mxu1  ;;  %v692_v56 = vmax.f32 %v590_v24, 0.0 }
 0x111   : > { %1695 = vst.msk [vmem:[%s2647_s26 + $0x40] sm:$0xff] %vm352_vm1, %v1659_v19  ;;  %v1528_v25 = vadd.f32 %v2049_v23, %v2636_v36  ;;  %v1522_v26 = vpop.f32.mrb[9].mxu1  ;;  %v2008_v30 = vpop.f32.mrb[16].mxu0 }
 0x112   : > { %v1523_v28 = vadd.f32 %v2636_v36, %v1522_v26  ;;  %726 = vst.msk [vmem:[%s2614_s19 + $0x78] sm:$0xff] %vm710_vm2, %v693_v27  ;;  %725 = vst.msk [vmem:[%s2614_s19 + $0x70] sm:$0xff] %vm710_vm2, %v692_v56  ;;  %v605_v32 = vadd.f32 %v2008_v30, %v2606_v14  ;;  %v599_v22 = vpop.f32.mrb[17].mxu0 }
 0x113   : > { %v1662_v29 = vmax.f32 %v1528_v25, 0.0  ;;  %v600_v33 = vadd.f32 %v2606_v14, %v599_v22 }
 0x114   : > { %v1661_v31 = vmax.f32 %v1523_v28, 0.0  ;;  %v695_v37 = vmax.f32 %v605_v32, 0.0 }
 0x115   : > { %1698 = vst.msk [vmem:[%s2647_s26 + $0x58] sm:$0xff] %vm352_vm1, %v1662_v29  ;;  %v2052_v35 = vpop.f32.mrb[10].mxu1  ;;  %v694_v40 = vmax.f32 %v600_v33, 0.0 }
 0x116   : > { %1697 = vst.msk [vmem:[%s2647_s26 + $0x50] sm:$0xff] %vm352_vm1, %v1661_v31  ;;  %v1538_v38 = vadd.f32 %v2052_v35, %v2636_v36  ;;  %v1532_v39 = vpop.f32.mrb[11].mxu1  ;;  %v2011_v43 = vpop.f32.mrb[18].mxu0 }
 0x117   : > { %v1533_v41 = vadd.f32 %v2636_v36, %v1532_v39  ;;  %728 = vst.msk [vmem:[%s2614_s19 + $0x88] sm:$0xff] %vm710_vm2, %v695_v37  ;;  %727 = vst.msk [vmem:[%s2614_s19 + $0x80] sm:$0xff] %vm710_vm2, %v694_v40  ;;  %v615_v45 = vadd.f32 %v2011_v43, %v2606_v14  ;;  %v609_v46 = vpop.f32.mrb[19].mxu0 }
 0x118   : > { %v1664_v42 = vmax.f32 %v1538_v38, 0.0  ;;  %v610_v48 = vadd.f32 %v2606_v14, %v609_v46 }
 0x119   : > { %v1663_v44 = vmax.f32 %v1533_v41, 0.0  ;;  %v697_v51 = vmax.f32 %v615_v45, 0.0 }
 0x11a   : > { %1700 = vst.msk [vmem:[%s2647_s26 + $0x68] sm:$0xff] %vm352_vm1, %v1664_v42  ;;  %v2055_v47 = vpop.f32.mrb[12].mxu1  ;;  %v696_v53 = vmax.f32 %v610_v48, 0.0 }
 0x11b   : > { %1699 = vst.msk [vmem:[%s2647_s26 + $0x60] sm:$0xff] %vm352_vm1, %v1663_v44  ;;  %v1548_v49 = vadd.f32 %v2055_v47, %v2636_v36  ;;  %v1542_v50 = vpop.f32.mrb[13].mxu1 }
 0x11c   : > { %v1543_v52 = vadd.f32 %v2636_v36, %v1542_v50  ;;  %730 = vst.msk [vmem:[%s2614_s19 + $0x98] sm:$0xff] %vm710_vm2, %v697_v51  ;;  %v2014_v55 = vpop.f32.mrb[20].mxu0  ;;  %729 = vst.msk [vmem:[%s2614_s19 + $0x90] sm:$0xff] %vm710_vm2, %v696_v53 }
 0x11d   : > { %v1666_v54 = vmax.f32 %v1548_v49, 0.0  ;;  %v625_v58 = vadd.f32 %v2014_v55, %v2606_v14  ;;  %v619_v59 = vpop.f32.mrb[21].mxu0 }
 0x11e   : > { %v1665_v57 = vmax.f32 %v1543_v52, 0.0  ;;  %v620_v62 = vadd.f32 %v2606_v14, %v619_v59 }
 0x11f   : > { %1702 = vst.msk [vmem:[%s2647_s26 + $0x78] sm:$0xff] %vm352_vm1, %v1666_v54  ;;  %v699_v1 = vmax.f32 %v625_v58, 0.0 }
 0x120   : > { %v2058_v60 = vpop.f32.mrb[14].mxu1  ;;  %1701 = vst.msk [vmem:[%s2647_s26 + $0x70] sm:$0xff] %vm352_vm1, %v1665_v57  ;;  %v698_v3 = vmax.f32 %v620_v62, 0.0  ;;  %v2017_v5 = vpop.f32.mrb[22].mxu0 }
 0x121   : > { %v1558_v63 = vadd.f32 %v2058_v60, %v2636_v36  ;;  %v1552_v0 = vpop.f32.mrb[15].mxu1  ;;  %732 = vst.msk [vmem:[%s2614_s19 + $0xa8] sm:$0xff] %vm710_vm2, %v699_v1  ;;  %v635_v34 = vadd.f32 %v2017_v5, %v2606_v14  ;;  %v629_v6 = vpop.f32.mrb[23].mxu0 }
 0x122   : > { %v1553_v2 = vadd.f32 %v2636_v36, %v1552_v0  ;;  %731 = vst.msk [vmem:[%s2614_s19 + $0xa0] sm:$0xff] %vm710_vm2, %v698_v3  ;;  %v630_v7 = vadd.f32 %v2606_v14, %v629_v6 }
 0x123   : > { %v1668_v4 = vmax.f32 %v1558_v63, 0.0  ;;  %v701_v9 = vmax.f32 %v635_v34, 0.0 }
 0x124   : > { %v1667_v61 = vmax.f32 %v1553_v2, 0.0  ;;  %v700_v12 = vmax.f32 %v630_v7, 0.0 }
 0x125   : > { %1704 = vst.msk [vmem:[%s2647_s26 + $0x88] sm:$0xff] %vm352_vm1, %v1668_v4  ;;  %v2061_v8 = vpop.f32.mrb[16].mxu1 }
 0x126   : > { %1703 = vst.msk [vmem:[%s2647_s26 + $0x80] sm:$0xff] %vm352_vm1, %v1667_v61  ;;  %v1568_v10 = vadd.f32 %v2061_v8, %v2636_v36  ;;  %v1562_v11 = vpop.f32.mrb[17].mxu1  ;;  %v2020_v16 = vpop.f32.mrb[24].mxu0 }
 0x127   : > { %v1563_v13 = vadd.f32 %v2636_v36, %v1562_v11  ;;  %734 = vst.msk [vmem:[%s2614_s19 + $0xb8] sm:$0xff] %vm710_vm2, %v701_v9  ;;  %733 = vst.msk [vmem:[%s2614_s19 + $0xb0] sm:$0xff] %vm710_vm2, %v700_v12  ;;  %v645_v18 = vadd.f32 %v2020_v16, %v2606_v14  ;;  %v639_v19 = vpop.f32.mrb[25].mxu0 }
 0x128   : > { %v1670_v15 = vmax.f32 %v1568_v10, 0.0  ;;  %v640_v21 = vadd.f32 %v2606_v14, %v639_v19 }
 0x129   : > { %v1669_v17 = vmax.f32 %v1563_v13, 0.0  ;;  %v703_v25 = vmax.f32 %v645_v18, 0.0 }
 0x12a   : > { %1706 = vst.msk [vmem:[%s2647_s26 + $0x98] sm:$0xff] %vm352_vm1, %v1670_v15  ;;  %v2064_v20 = vpop.f32.mrb[18].mxu1  ;;  %v702_v27 = vmax.f32 %v640_v21, 0.0 }
 0x12b   : > { %1705 = vst.msk [vmem:[%s2647_s26 + $0x90] sm:$0xff] %vm352_vm1, %v1669_v17  ;;  %v1578_v23 = vadd.f32 %v2064_v20, %v2636_v36  ;;  %v1572_v24 = vpop.f32.mrb[19].mxu1 }
 0x12c   : > { %v1573_v26 = vadd.f32 %v2636_v36, %v1572_v24  ;;  %736 = vst.msk [vmem:[%s2614_s19 + $0xc8] sm:$0xff] %vm710_vm2, %v703_v25  ;;  %v2023_v56 = vpop.f32.mrb[26].mxu0  ;;  %735 = vst.msk [vmem:[%s2614_s19 + $0xc0] sm:$0xff] %vm710_vm2, %v702_v27 }
 0x12d   : > { %v1672_v28 = vmax.f32 %v1578_v23, 0.0  ;;  %v655_v30 = vadd.f32 %v2023_v56, %v2606_v14  ;;  %v649_v31 = vpop.f32.mrb[27].mxu0 }
 0x12e   : > { %v1671_v29 = vmax.f32 %v1573_v26, 0.0  ;;  %v650_v22 = vadd.f32 %v2606_v14, %v649_v31 }
 0x12f   : > { %1708 = vst.msk [vmem:[%s2647_s26 + $0xa8] sm:$0xff] %vm352_vm1, %v1672_v28  ;;  %v2067_v32 = vpop.f32.mrb[20].mxu1  ;;  %v705_v37 = vmax.f32 %v655_v30, 0.0 }
 0x130   : > { %1707 = vst.msk [vmem:[%s2647_s26 + $0xa0] sm:$0xff] %vm352_vm1, %v1671_v29  ;;  %v1588_v33 = vadd.f32 %v2067_v32, %v2636_v36  ;;  %v1582_v35 = vpop.f32.mrb[21].mxu1  ;;  %v704_v39 = vmax.f32 %v650_v22, 0.0  ;;  %v2026_v41 = vpop.f32.mrb[28].mxu0 }
 0x131   : > { %v1583_v38 = vadd.f32 %v2636_v36, %v1582_v35  ;;  %738 = vst.msk [vmem:[%s2614_s19 + $0xd8] sm:$0xff] %vm710_vm2, %v705_v37  ;;  %v665_v43 = vadd.f32 %v2026_v41, %v2606_v14  ;;  %v659_v44 = vpop.f32.mrb[29].mxu0 }
 0x132   : > { %v1674_v40 = vmax.f32 %v1588_v33, 0.0  ;;  %737 = vst.msk [vmem:[%s2614_s19 + $0xd0] sm:$0xff] %vm710_vm2, %v704_v39  ;;  %v660_v45 = vadd.f32 %v2606_v14, %v659_v44 }
 0x133   : > { %v1673_v42 = vmax.f32 %v1583_v38, 0.0  ;;  %v707_v47 = vmax.f32 %v665_v43, 0.0 }
 0x134   : > { %1710 = vst.msk [vmem:[%s2647_s26 + $0xb8] sm:$0xff] %vm352_vm1, %v1674_v40  ;;  %v706_v50 = vmax.f32 %v660_v45, 0.0 }
 0x135   : > { %1709 = vst.msk [vmem:[%s2647_s26 + $0xb0] sm:$0xff] %vm352_vm1, %v1673_v42  ;;  %v2070_v46 = vpop.f32.mrb[22].mxu1 }
 0x136   : > { %v1598_v48 = vadd.f32 %v2070_v46, %v2636_v36  ;;  %v1592_v49 = vpop.f32.mrb[23].mxu1  ;;  %740 = vst.msk [vmem:[%s2614_s19 + $0xe8] sm:$0xff] %vm710_vm2, %v707_v47  ;;  %739 = vst.msk [vmem:[%s2614_s19 + $0xe0] sm:$0xff] %vm710_vm2, %v706_v50  ;;  %v2029_v53 = vpop.f32.mrb[30].mxu0 }
 0x137   : > { %v1593_v51 = vadd.f32 %v2636_v36, %v1592_v49  ;;  %v675_v55 = vadd.f32 %v2029_v53, %v2606_v14  ;;  %v669_v57 = vpop.f32.mrb[31].mxu0 }
 0x138   : > { %v1676_v52 = vmax.f32 %v1598_v48, 0.0  ;;  %v670_v59 = vadd.f32 %v2606_v14, %v669_v57 }
 0x139   : > { %v1675_v54 = vmax.f32 %v1593_v51, 0.0  ;;  %v709_v63 = vmax.f32 %v675_v55, 0.0 }
 0x13a   : > { %1712 = vst.msk [vmem:[%s2647_s26 + $0xc8] sm:$0xff] %vm352_vm1, %v1676_v52  ;;  %v2073_v58 = vpop.f32.mrb[24].mxu1  ;;  %v708_v1 = vmax.f32 %v670_v59, 0.0 }
 0x13b   : > { %1711 = vst.msk [vmem:[%s2647_s26 + $0xc0] sm:$0xff] %vm352_vm1, %v1675_v54  ;;  %v1608_v60 = vadd.f32 %v2073_v58, %v2636_v36  ;;  %v1602_v62 = vpop.f32.mrb[25].mxu1 }
 0x13c   : > { %v1603_v0 = vadd.f32 %v2636_v36, %v1602_v62  ;;  %742 = vst.msk [vmem:[%s2614_s19 + $0xf8] sm:$0xff] %vm710_vm2, %v709_v63  ;;  %741 = vst.msk [vmem:[%s2614_s19 + $0xf0] sm:$0xff] %vm710_vm2, %v708_v1 }
 0x13d   : > { %v1678_v2 = vmax.f32 %v1608_v60, 0.0 }
 0x13e   : > { %v1677_v3 = vmax.f32 %v1603_v0, 0.0 }
 0x13f   : > { %1714 = vst.msk [vmem:[%s2647_s26 + $0xd8] sm:$0xff] %vm352_vm1, %v1678_v2  ;;  %v2076_v14 = vpop.f32.mrb[26].mxu1 }
 0x140   : > { %1713 = vst.msk [vmem:[%s2647_s26 + $0xd0] sm:$0xff] %vm352_vm1, %v1677_v3  ;;  %v1618_v4 = vadd.f32 %v2076_v14, %v2636_v36  ;;  %v1612_v5 = vpop.f32.mrb[27].mxu1 }
 0x141   : > { %v1613_v61 = vadd.f32 %v2636_v36, %v1612_v5  ;;  %v2034_v34 = vpop.f32.mrb[32].mxu0 }
 0x142   : > { %v1680_v6 = vmax.f32 %v1618_v4, 0.0  ;;  %v1478_v7 = vadd.f32 %v2034_v34, %v2636_v36  ;;  %v1472_v8 = vpop.f32.mrb[33].mxu0 }
 0x143   : > { %v1679_v9 = vmax.f32 %v1613_v61, 0.0  ;;  %v1473_v10 = vadd.f32 %v2636_v36, %v1472_v8 }
 0x144   : > { %1716 = vst.msk [vmem:[%s2647_s26 + $0xe8] sm:$0xff] %vm352_vm1, %v1680_v6  ;;  %v1652_v11 = vmax.f32 %v1478_v7, 0.0 }
 0x145   : > { %1715 = vst.msk [vmem:[%s2647_s26 + $0xe0] sm:$0xff] %vm352_vm1, %v1679_v9  ;;  %v2079_v12 = vpop.f32.mrb[28].mxu1  ;;  %v1651_v13 = vmax.f32 %v1473_v10, 0.0 }
 0x146   : > { %v1628_v15 = vadd.f32 %v2079_v12, %v2636_v36  ;;  %v1622_v16 = vpop.f32.mrb[29].mxu1  ;;  %1688 = vst.msk [vmem:[%s2647_s26 + $0x8] sm:$0xff] %vm352_vm1, %v1652_v11 }
 0x147   : > { %v1623_v17 = vadd.f32 %v2636_v36, %v1622_v16  ;;  %1687 = vst.msk [vmem:[%s2647_s26] sm:$0xff] %vm352_vm1, %v1651_v13 }
 0x148   : > { %v1682_v18 = vmax.f32 %v1628_v15, 0.0 }
 0x149   : > { %v1681_v19 = vmax.f32 %v1623_v17, 0.0 }
 0x14a   : > { %1718 = vst.msk [vmem:[%s2647_s26 + $0xf8] sm:$0xff] %vm352_vm1, %v1682_v18 }
 0x14b   : > { %v2082_v20 = vpop.f32.mrb[30].mxu1  ;;  %1717 = vst.msk [vmem:[%s2647_s26 + $0xf0] sm:$0xff] %vm352_vm1, %v1681_v19 }
 0x14c   : > { %v1638_v21 = vadd.f32 %v2082_v20, %v2636_v36  ;;  %v1632_v23 = vpop.f32.mrb[31].mxu1 }
 0x14d   : > { %v1633_v24 = vadd.f32 %v2636_v36, %v1632_v23 }
 0x14e   : > { %v1684_v25 = vmax.f32 %v1638_v21, 0.0 }
 0x14f   : > { %v1683_v26 = vmax.f32 %v1633_v24, 0.0  ;;  %v2085_v27 = vpop.f32.mrb[32].mxu1 }
 0x150   : > { %1720 = vst.msk [vmem:[%s2647_s26 + $0x108] sm:$0xff] %vm352_vm1, %v1684_v25  ;;  %v1648_v28 = vadd.f32 %v2085_v27, %v2636_v36  ;;  %v1642_v56 = vpop.f32.mrb[33].mxu1 }
 0x151   : > { %1719 = vst.msk [vmem:[%s2647_s26 + $0x100] sm:$0xff] %vm352_vm1, %v1683_v26  ;;  %v1643_v29 = vadd.f32 %v2636_v36, %v1642_v56 }
 0x152   : > { %v1686_v30 = vmax.f32 %v1648_v28, 0.0 }
 0x153   : > { %v1685_v31 = vmax.f32 %v1643_v29, 0.0 }
 0x154   : > { %1722 = vst.msk [vmem:[%s2647_s26 + $0x118] sm:$0xff] %vm352_vm1, %v1686_v30 }
 0x155   : > { %1721 = vst.msk [vmem:[%s2647_s26 + $0x110] sm:$0xff] %vm352_vm1, %v1685_v31 }
 0x156 PF: > { %s18_s24 = sadd.s32 1, %s2104_s24  }
 0x157   : > { %p15_p4 = scmp.ge.s32.totalorder %s18_s24, 4  }
 0x159   :  { %17 = sbr.rel (!%p15_p4) target bundleno = 1 (0x1), region = 89 }

</bundles_post_ra>
